<compile_context>
chip_gen: v6e
topology: v6e:2x2x1
jax: 0.10.0
libtpu: 0.0.40
codegen_flags: <defaults>
</compile_context>

<pallas_src>
import functools

import jax
import jax.numpy as jnp
import numpy as np
from jax.experimental import pallas as pl
from jax.experimental.pallas import tpu as pltpu


def _round_up(x, m):
    return (x + m - 1) // m * m


def _vmem_capacity_bytes():
    # v5e/v6e: 128 MiB, v7x: 64 MiB.  Fall back to the smallest figure if the query is
    # unavailable so the tiling stays safe on every generation.
    try:
        cap = int(pltpu.get_tpu_info().vmem_capacity_bytes)
        if cap > 0:
            return cap
    except Exception:
        pass
    return 64 * 1024 * 1024


def _conv_bias_relu_kernel(a_ref, b_ref, bias_ref, o_ref, *, offsets, tm):
    """One (tm, tn) output tile of the folded conv + BN + ReLU.

    a_ref:    (tm + halo, KW*Cin) bf16 -- contiguous flattened input rows (tile + halo),
                                          width taps already unfolded into channels.
    b_ref:    (KH, KW*Cin, tn)    bf16 -- BN-scale-folded conv weights.
    bias_ref: (1, tn)             f32  -- folded BN bias.
    o_ref:    (tm, tn)            bf16 -- output tile (single store, no scratch).
    """
    tn = o_ref.shape[1]
    acc = jnp.zeros((tm, tn), jnp.float32)
    for kh, off in enumerate(offsets):            # static, unrolled (KH is small)
        a_k = a_ref[pl.ds(off, tm), :]            # `off` is a static multiple of 16
        acc = acc + jnp.dot(a_k, b_ref[kh], preferred_element_type=jnp.float32)
    y = acc + bias_ref[...]
    o_ref[...] = jnp.maximum(y, 0.0).astype(o_ref.dtype)


@functools.partial(jax.jit, static_argnames=("stride", "padding"))
def conv_bn_act(x_nchw, w, gamma, beta, running_mean, running_var,
                eps=1e-5, *, stride=1, padding=0):
    N, C, H, W = x_nchw.shape
    Cout, Cin, KH, KW = w.shape
    assert C == Cin, "groups != 1 not supported"

    s, p = stride, padding
    Hp, Wp = H + 2 * p, W + 2 * p
    OH = (Hp - KH) // s + 1
    OW = (Wp - KW) // s + 1

    # Pad the (conv-padded) width up to a multiple of 16 so that all in-kernel row
    # offsets (kh * Wp_a) land on packed bf16 sublane-tile boundaries.
    Wp_a = max(_round_up(Wp, 16), 16)
    Cg = KW * Cin                       # channels after unfolding the width taps
    Cout_pad = _round_up(Cout, 128)

    # ---- fold BN (eval mode): scale into the weights, bias added in-kernel -------------
    inv_std = 1.0 / jnp.sqrt(running_var.astype(jnp.float32) + eps)
    scale = gamma.astype(jnp.float32) * inv_std                         # (Cout,)
    bias = beta.astype(jnp.float32) - running_mean.astype(jnp.float32) * scale

    # (Cout, Cin, KH, KW) -> (KH, KW, Cin, Cout) -> (KH, KW*Cin, Cout_pad), bf16.
    w2 = jnp.transpose(w.astype(jnp.float32), (2, 3, 1, 0)).reshape(KH, Cg, Cout)
    w2 = (w2 * scale[None, None, :]).astype(jnp.bfloat16)
    if Cout_pad != Cout:
        w2 = jnp.pad(w2, ((0, 0), (0, 0), (0, Cout_pad - Cout)))
    bias_p = jnp.pad(bias, (0, Cout_pad - Cout)).reshape(1, Cout_pad)

    # ---- input glue: NCHW -> NHWC bf16, spatial pad, unfold width taps -----------------
    xp = jnp.transpose(x_nchw, (0, 2, 3, 1)).astype(jnp.bfloat16)
    # zero-pad: conv padding + width alignment + (KW-1) slack for the width unfolding
    xp = jnp.pad(xp, ((0, 0), (p, p), (p, Wp_a - Wp + p + KW - 1), (0, 0)))
    # xw[n, h, w, kw*Cin + c] = xp_padded[n, h, w + kw, c]
    if KW > 1:
        xw = jnp.concatenate([xp[:, :, kw:kw + Wp_a, :] for kw in range(KW)], axis=-1)
    else:
        xw = xp[:, :, :Wp_a, :]
    Mflat = N * Hp * Wp_a

    # Row offsets of the KH height taps in the flattened (N*Hp*Wp_a, KW*Cin) view.
    offsets = tuple(kh * Wp_a for kh in range(KH))
    halo = offsets[-1]                  # (KH-1) * Wp_a, a multiple of 16

    # ---- generation-aware tile selection ------------------------------------------------
    vmem_cap = _vmem_capacity_bytes()
    tile_budget = int(vmem_cap * 0.45)
    vmem_limit = min(int(vmem_cap * 0.70), vmem_cap - 2 * 1024 * 1024)

    def vmem_bytes(tm_, tn_):
        a_blk = (tm_ + halo) * Cg * 2          # bf16 slab
        b_blk = KH * Cg * tn_ * 2              # bf16 weights
        o_blk = tm_ * tn_ * 2                  # bf16 output
        return 2 * (a_blk + b_blk + o_blk + tn_ * 4) + tm_ * tn_ * 4   # + f32 acc

    tm_min = max(128, halo)

    tn = 128
    for cand in (512, 256):
        if Cout_pad % cand == 0 and vmem_bytes(tm_min, cand) <= tile_budget:
            tn = cand
            break
    Jt = Cout_pad // tn

    tm = tm_min
    for cand in (2048, 1024, 512, 256, 128):
        if cand >= tm_min and vmem_bytes(cand, tn) <= tile_budget:
            tm = cand
            break
    # v7x has two TensorCores; keep >= 2 blocks along the 'parallel' axes when possible.
    if Jt * pl.cdiv(Mflat, tm) < 2:
        for cand in (1024, 512, 256, 128):
            if (tm_min <= cand <= tm and pl.cdiv(Mflat, cand) >= 2
                    and vmem_bytes(cand, tn) <= tile_budget):
                tm = cand
                break

    Mt = pl.cdiv(Mflat, tm)
    Mpad = Mt * tm

    # ---- per-tile input slabs: tile rows + (KH-1)*Wp_a halo (no KH-fold inflation) -----
    xflat = xw.reshape(Mflat, Cg)
    xflat = jnp.pad(xflat, ((0, Mpad + tm - Mflat), (0, 0)))
    main = xflat[:Mpad].reshape(Mt, tm, Cg)
    if halo:
        tail = xflat[tm:tm + Mpad].reshape(Mt, tm, Cg)[:, :halo]
        a3 = jnp.concatenate([main, tail], axis=1)       # (Mt, tm + halo, Cg)
    else:
        a3 = main

    cost = pl.CostEstimate(
        flops=2 * Mpad * KH * Cg * Cout_pad,
        transcendentals=0,
        bytes_accessed=(Mt * (tm + halo) * Cg * 2 * Jt       # slab re-read per Cout tile
                        + KH * Cg * Cout_pad * 2 * Mt        # weights re-read per M tile
                        + Mpad * Cout_pad * 2),              # bf16 output
    )

    kernel = functools.partial(_conv_bias_relu_kernel, offsets=offsets, tm=tm)
    out_flat = pl.pallas_call(
        kernel,
        out_shape=jax.ShapeDtypeStruct((Mpad, Cout_pad), jnp.bfloat16),
        grid=(Mt, Jt),
        in_specs=[
            pl.BlockSpec((None, tm + halo, Cg), lambda i, j: (i, 0, 0)),
            pl.BlockSpec((KH, Cg, tn), lambda i, j: (0, 0, j)),
            pl.BlockSpec((1, tn), lambda i, j: (0, j)),
        ],
        out_specs=pl.BlockSpec((tm, tn), lambda i, j: (i, j)),
        compiler_params=pltpu.CompilerParams(
            dimension_semantics=("parallel", "parallel"),
            vmem_limit_bytes=vmem_limit),
        cost_estimate=cost,
    )(a3, w2, bias_p)

    # ---- extract the valid (stride-subsampled) output positions, back to NCHW ----------
    out = out_flat[:Mflat].reshape(N, Hp, Wp_a, Cout_pad)
    out = out[:, :s * (OH - 1) + 1:s, :s * (OW - 1) + 1:s, :Cout]
    return jnp.transpose(out, (0, 3, 1, 2))


def _reference(x_nchw, w, gamma, beta, running_mean, running_var,
               eps=1e-5, stride=1, padding=1):
    y = jax.lax.conv_general_dilated(
        x_nchw.astype(jnp.float32), w.astype(jnp.float32),
        window_strides=(stride, stride),
        padding=[(padding, padding), (padding, padding)],
        dimension_numbers=("NCHW", "OIHW", "NCHW"))
    inv = 1.0 / jnp.sqrt(running_var + eps)
    y = (y - running_mean[None, :, None, None]) * inv[None, :, None, None]
    y = y * gamma[None, :, None, None] + beta[None, :, None, None]
    return jnp.maximum(y, 0.0)


if __name__ == "__main__":
    key = jax.random.PRNGKey(0)
    k1, k2 = jax.random.split(key)

    # Module config: ConvBNAct(in_c=4, out_c=8, kernel_s=3, stride=1, padding=1)
    N, C_in, H, W = 2, 4, 16, 16
    C_out, KH, KW = 8, 3, 3

    x = jax.random.normal(k1, (N, C_in, H, W), dtype=jnp.float32)
    w = jax.random.normal(k2, (C_out, C_in, KH, KW), dtype=jnp.float32) * 0.1

    gamma = jnp.linspace(0.5, 1.5, C_out, dtype=jnp.float32)
    beta = jnp.linspace(-0.1, 0.1, C_out, dtype=jnp.float32)
    running_mean = jnp.linspace(-0.2, 0.2, C_out, dtype=jnp.float32)
    running_var = jnp.linspace(0.5, 1.5, C_out, dtype=jnp.float32)

    out = conv_bn_act(x, w, gamma, beta, running_mean, running_var,
                      stride=1, padding=1)
    out = jax.block_until_ready(out)

    ref = _reference(x, w, gamma, beta, running_mean, running_var,
                     stride=1, padding=1)
    ref = jax.block_until_ready(ref)

    assert out.shape == (N, C_out, H, W), out.shape
    # bf16 MXU operands + bf16 output storage vs. the f32 reference -> bf16 tolerance.
    np.testing.assert_allclose(np.asarray(out).astype(np.float32), np.asarray(ref),
                               rtol=2e-2, atol=3e-2)
    print("KERNEL_OK")
</pallas_src>

<mosaic_0001>
module attributes {stable_mosaic.version = 11 : i64} {
  func.func @_conv_bias_relu_kernel(%arg0: i32, %arg1: i32, %arg2: memref<1x1088x12xbf16, #tpu.memory_space<vmem>>, %arg3: memref<3x12x128xbf16, #tpu.memory_space<vmem>>, %arg4: memref<1x128xf32, #tpu.memory_space<vmem>>, %arg5: memref<1024x128xbf16, #tpu.memory_space<vmem>>) attributes {dimension_semantics = [#tpu.dimension_semantics<parallel>, #tpu.dimension_semantics<parallel>], iteration_bounds = array<i64: 2, 1>, scalar_prefetch = 0 : i64, scratch_operands = 0 : i64, tpu.core_type = #tpu.core_type<tc>, window_params = [{transform_indices = @transform_0, window_bounds = array<i64: 1, 1088, 12>}, {transform_indices = @transform_1, window_bounds = array<i64: 3, 12, 128>}, {transform_indices = @transform_2, window_bounds = array<i64: 1, 128>}, {transform_indices = @transform_3, window_bounds = array<i64: 1024, 128>}]} {
    %cst = arith.constant 0.000000e+00 : f32
    %0 = vector.broadcast %cst : f32 to vector<1024x128xf32>
    %c0 = arith.constant 0 : index
    %c0_0 = arith.constant 0 : index
    %c0_1 = arith.constant 0 : index
    %1 = vector.load %arg2[%c0, %c0_0, %c0_1] : memref<1x1088x12xbf16, #tpu.memory_space<vmem>>, vector<1x1024x12xbf16>
    %2 = vector.shape_cast %1 : vector<1x1024x12xbf16> to vector<1024x12xbf16>
    %c0_2 = arith.constant 0 : index
    %c0_3 = arith.constant 0 : index
    %c0_4 = arith.constant 0 : index
    %3 = vector.load %arg3[%c0_2, %c0_3, %c0_4] : memref<3x12x128xbf16, #tpu.memory_space<vmem>>, vector<1x12x128xbf16>
    %4 = vector.shape_cast %3 : vector<1x12x128xbf16> to vector<12x128xbf16>
    %cst_5 = arith.constant dense<0.000000e+00> : vector<1024x128xf32>
    %5 = tpu.matmul %2, %4, %cst_5 {dimension_numbers = #tpu.dot_dimension_numbers<[1], [0], [0], [1], [0, 0, 1, 1], [], []>} : vector<1024x12xbf16>, vector<12x128xbf16>, vector<1024x128xf32> -> vector<1024x128xf32>
    %6 = arith.addf %0, %5 : vector<1024x128xf32>
    %c0_6 = arith.constant 0 : index
    %c32 = arith.constant 32 : index
    %c0_7 = arith.constant 0 : index
    %7 = vector.load %arg2[%c0_6, %c32, %c0_7] : memref<1x1088x12xbf16, #tpu.memory_space<vmem>>, vector<1x1024x12xbf16>
    %8 = vector.shape_cast %7 : vector<1x1024x12xbf16> to vector<1024x12xbf16>
    %c1 = arith.constant 1 : index
    %c0_8 = arith.constant 0 : index
    %c0_9 = arith.constant 0 : index
    %9 = vector.load %arg3[%c1, %c0_8, %c0_9] : memref<3x12x128xbf16, #tpu.memory_space<vmem>>, vector<1x12x128xbf16>
    %10 = vector.shape_cast %9 : vector<1x12x128xbf16> to vector<12x128xbf16>
    %cst_10 = arith.constant dense<0.000000e+00> : vector<1024x128xf32>
    %11 = tpu.matmul %8, %10, %cst_10 {dimension_numbers = #tpu.dot_dimension_numbers<[1], [0], [0], [1], [0, 0, 1, 1], [], []>} : vector<1024x12xbf16>, vector<12x128xbf16>, vector<1024x128xf32> -> vector<1024x128xf32>
    %12 = arith.addf %6, %11 : vector<1024x128xf32>
    %c0_11 = arith.constant 0 : index
    %c64 = arith.constant 64 : index
    %c0_12 = arith.constant 0 : index
    %13 = vector.load %arg2[%c0_11, %c64, %c0_12] : memref<1x1088x12xbf16, #tpu.memory_space<vmem>>, vector<1x1024x12xbf16>
    %14 = vector.shape_cast %13 : vector<1x1024x12xbf16> to vector<1024x12xbf16>
    %c2 = arith.constant 2 : index
    %c0_13 = arith.constant 0 : index
    %c0_14 = arith.constant 0 : index
    %15 = vector.load %arg3[%c2, %c0_13, %c0_14] : memref<3x12x128xbf16, #tpu.memory_space<vmem>>, vector<1x12x128xbf16>
    %16 = vector.shape_cast %15 : vector<1x12x128xbf16> to vector<12x128xbf16>
    %cst_15 = arith.constant dense<0.000000e+00> : vector<1024x128xf32>
    %17 = tpu.matmul %14, %16, %cst_15 {dimension_numbers = #tpu.dot_dimension_numbers<[1], [0], [0], [1], [0, 0, 1, 1], [], []>} : vector<1024x12xbf16>, vector<12x128xbf16>, vector<1024x128xf32> -> vector<1024x128xf32>
    %18 = arith.addf %12, %17 : vector<1024x128xf32>
    %c0_16 = arith.constant 0 : index
    %c0_17 = arith.constant 0 : index
    %19 = vector.load %arg4[%c0_16, %c0_17] : memref<1x128xf32, #tpu.memory_space<vmem>>, vector<1x128xf32>
    %20 = vector.broadcast %19 : vector<1x128xf32> to vector<1024x128xf32>
    %21 = arith.addf %18, %20 : vector<1024x128xf32>
    %cst_18 = arith.constant 0.000000e+00 : f32
    %22 = vector.broadcast %cst_18 : f32 to vector<1024x128xf32>
    %23 = arith.maximumf %21, %22 : vector<1024x128xf32>
    %24 = arith.truncf %23 : vector<1024x128xf32> to vector<1024x128xbf16>
    %c0_19 = arith.constant 0 : index
    %c0_20 = arith.constant 0 : index
    %25 = vector.load %arg5[%c0_19, %c0_20] : memref<1024x128xbf16, #tpu.memory_space<vmem>>, vector<1024x128xbf16>
    tpu.vector_store %arg5[%c0_19, %c0_20], %24 {strides = array<i32>} : memref<1024x128xbf16, #tpu.memory_space<vmem>>, vector<1024x128xbf16>,
    return
  }
  func.func @transform_0(%arg0: i32, %arg1: i32) -> (i32, i32, i32) {
    %c0_i32 = arith.constant 0 : i32
    %c0_i32_0 = arith.constant 0 : i32
    %c0_i32_1 = arith.constant 0 : i32
    return %arg0, %c0_i32, %c0_i32_0 : i32, i32, i32
  }
  func.func @transform_1(%arg0: i32, %arg1: i32) -> (i32, i32, i32) {
    %c0_i32 = arith.constant 0 : i32
    %c0_i32_0 = arith.constant 0 : i32
    %c0_i32_1 = arith.constant 0 : i32
    return %c0_i32, %c0_i32_0, %arg1 : i32, i32, i32
  }
  func.func @transform_2(%arg0: i32, %arg1: i32) -> (i32, i32) {
    %c0_i32 = arith.constant 0 : i32
    %c0_i32_0 = arith.constant 0 : i32
    return %c0_i32, %arg1 : i32, i32
  }
  func.func @transform_3(%arg0: i32, %arg1: i32) -> (i32, i32) {
    %c0_i32 = arith.constant 0 : i32
    return %arg0, %arg1 : i32, i32
  }
}

</mosaic_0001>

<bundles_post_ra>
// kernel: conv_bn_act.1
= control target key start
LH: loop header
LB: loop body
LE: loop exit
PB: predicated region body
PF: predicated region fallthrough
CT: control target
= control target key end

     0   :  { %s6123_s12 = smov 0   ;;  %s6125_s13 = smov 0   ;;  %s7271_s0 = inlined_call_operand.vmem [shape: bf16[2,1088,12], index: 0, kind: input, shape index: {}]   ;;  %s7272_s1 = inlined_call_operand.vmem [shape: bf16[3,12,128], index: 1, kind: input, shape index: {}]   ;;  %s7273_s2 = inlined_call_operand.vmem [shape: f32[1,128], index: 2, kind: input, shape index: {}]   ;;  %s7274_s3 = inlined_call_operand.vmem [shape: bf16[2048,128], index: 3, kind: output, shape index: {}]  }
   0x1   :  { %s6127_s14 = smov 0  }
   0x2 LB: > { %s25_s15 = sadd.s32 1, %s6097_s13  ;;  %p4332_p0 = scmp.ge.s32.totalorder %s6101_s14, 1  ;;  %s6101_s14 = sphi %s6127_s14, %s13_s14   ;;  %s6097_s13 = sphi %s6125_s13, %s7444_s13   ;;  %s6093_s12 = sphi %s6123_s12, %s7443_s12  }
   0x3   : > { %p27_p1 = scmp.ge.s32.totalorder %s25_s15, 2  ;;  %p168_p2 = scmp.lt.s32.totalorder %s6101_s14, 3 }
   0x5   : > { %s7446_s15 = smov (%p27_p1, %s25_s15), 0  ;;  %p169_p3 = pnand %p4332_p0, %p168_p2 }
   0x7   : > { %172 = sbr.rel (%p169_p3) target bundleno = 608 (0x260), region = 32 }
   0xc   : > { %v5923_v0 = vld [vmem:[%s7272_s1 + $0x8] sm:$0x3f]   ;;  %vm879_vm0 = vcmask 1045504   ;;  %p202_p4 = scmp.lt.s32.totalorder %s6093_s12, 1  ;;  %v5926_v2 = vld [vmem:[%s7272_s1] sm:$0x3f]  }
   0xd   : > { %5895 = vmatprep.subr.msk.bf16.mxu1 %vm879_vm0, %v5923_v0  ;;  %5894 = vmatprep.subr.msk.bf16.mxu0 %vm879_vm0, %v5923_v0  ;;  %v881_v1 = vsel %vm879_vm0, %v5923_v0, 0  ;;  %v5929_v3 = vld [vmem:[%s7272_s1 + $0x10] sm:$0x3f]   ;;  %vm686_vm1 = vcmask 97280   ;;  %v1450_v9 = vsel %vm879_vm0, %v5926_v2, 0  ;;  %s4334_s27 = sshll.u32 %s6093_s12, 7 }
   0xe   : > { %5893 = vmatpush3.bf16.msra.mxu1 %v881_v1  ;;  %5503 = vmatpush3.bf16.msra.mxu0 %v881_v1  ;;  %s203_s20 = scalar_select %p202_p4, %s6093_s12, 1  ;;  %v2646_v7 = vsel %vm879_vm0, %v5929_v3, 0 }
   0xf   : > { %5896 = vmatprep.subr.msk.bf16.mxu1 %vm879_vm0, %v5926_v2  ;;  %5897 = vmatprep.subr.msk.bf16.mxu0 %vm879_vm0, %v5929_v3  ;;  %p215_p5 = scmp.lt.s32.totalorder %s4334_s27, 255 }
  0x10   : > { %s5898_s23 = smul.u32 544, %s203_s20 }
  0x11   : > { %s7448_s27 = smov (!%p215_p5, %s4334_s27), 255 }
  0x12   : > { %s6162_s26 = scalar_lea.vmem %s7271_s0, %s5898_s23  ;;  %s4335_s30 = sshll.u32 %s7448_s27, 2 }
  0x13   : > { %v6165_v4 = vld [vmem:[%s6162_s26 + $0x10] sm:$0xff]   ;;  %v6171_v6 = vld [vmem:[%s6162_s26 + $0x18] sm:$0xff]   ;;  %v6180_v10 = vld [vmem:[%s6162_s26 + $0x20] sm:$0xff]   ;;  %s6902_s6 = scalar_lea.vmem %s7274_s3, %s4335_s30 }
  0x14   : > { %v5925_v5 = vld [vmem:[%s6162_s26 + $0x110] sm:$0xff]   ;;  %5504 = vmatprep.mubr.msk.bf16.mxu0 %vm686_vm1, %v6165_v4  ;;  %v5928_v8 = vld [vmem:[%s6162_s26 + $0x118] sm:$0xff]   ;;  %v5931_v11 = vld [vmem:[%s6162_s26 + $0x120] sm:$0xff]  }
  0x15   : > { %5568 = vmatprep.mubr.msk.bf16.mxu1 %vm686_vm1, %v5925_v5  ;;  %5505 = vmatmul.mubr.msk.bf16.vlgmr.msra.gmra.mxu0 %vm686_vm1, %v6171_v6  ;;  %v6188_v12 = vld [vmem:[%s6162_s26 + $0x28] sm:$0xff]   ;;  %v6192_v14 = vld [vmem:[%s6162_s26 + $0x30] sm:$0xff]   ;;  %v6202_v16 = vld [vmem:[%s6162_s26 + $0x38] sm:$0xff]  }
  0x16   : > { %5569 = vmatmul.mubr.msk.bf16.vlgmr.msra.gmra.mxu1 %vm686_vm1, %v5928_v8  ;;  %5763 = vmatpush3.bf16.msra.mxu0 %v2646_v7  ;;  %v5933_v13 = vld [vmem:[%s6162_s26 + $0x128] sm:$0xff]   ;;  %v5935_v15 = vld [vmem:[%s6162_s26 + $0x130] sm:$0xff]   ;;  %v5937_v17 = vld [vmem:[%s6162_s26 + $0x138] sm:$0xff]  }
  0x17   : > { %5633 = vmatpush3.bf16.msra.mxu1 %v1450_v9  ;;  %5508 = vmatprep.mubr.msk.bf16.mxu0 %vm686_vm1, %v6180_v10  ;;  %v6206_v18 = vld [vmem:[%s6162_s26 + $0x40] sm:$0xff]   ;;  %v6216_v20 = vld [vmem:[%s6162_s26 + $0x48] sm:$0xff]   ;;  %v6220_v22 = vld [vmem:[%s6162_s26 + $0x50] sm:$0xff]  }
  0x18   : > { %5572 = vmatprep.mubr.msk.bf16.mxu1 %vm686_vm1, %v5931_v11  ;;  %v5939_v19 = vld [vmem:[%s6162_s26 + $0x140] sm:$0xff]   ;;  %v5941_v21 = vld [vmem:[%s6162_s26 + $0x148] sm:$0xff]   ;;  %v5943_v23 = vld [vmem:[%s6162_s26 + $0x150] sm:$0xff]  }
  0x19   : > { %v6230_v24 = vld [vmem:[%s6162_s26 + $0x58] sm:$0xff]   ;;  %v6234_v26 = vld [vmem:[%s6162_s26 + $0x60] sm:$0xff]   ;;  %v6244_v28 = vld [vmem:[%s6162_s26 + $0x68] sm:$0xff]  }
  0x1a   : > { %v5945_v25 = vld [vmem:[%s6162_s26 + $0x158] sm:$0xff]   ;;  %v5947_v27 = vld [vmem:[%s6162_s26 + $0x160] sm:$0xff]   ;;  %v5949_v29 = vld [vmem:[%s6162_s26 + $0x168] sm:$0xff]  }
  0x1b   : > { %v6248_v30 = vld [vmem:[%s6162_s26 + $0x70] sm:$0xff]   ;;  %v6258_v32 = vld [vmem:[%s6162_s26 + $0x78] sm:$0xff]   ;;  %v6264_v34 = vld [vmem:[%s6162_s26 + $0x80] sm:$0xff]  }
  0x1c   : > { %v5951_v31 = vld [vmem:[%s6162_s26 + $0x170] sm:$0xff]   ;;  %v6261_v33 = vld [vmem:[%s6162_s26 + $0x178] sm:$0xff]   ;;  %v6267_v35 = vld [vmem:[%s6162_s26 + $0x180] sm:$0xff]  }
  0x1d   : > { %5509 = vmatmul.mubr.msk.bf16.gmra.mxu0 %vm686_vm1, %v6188_v12  ;;  %v6278_v36 = vld [vmem:[%s6162_s26 + $0x88] sm:$0xff]   ;;  %v6284_v38 = vld [vmem:[%s6162_s26 + $0x90] sm:$0xff]   ;;  %v6298_v40 = vld [vmem:[%s6162_s26 + $0x98] sm:$0xff]  }
  0x1e   : > { %5573 = vmatmul.mubr.msk.bf16.gmra.mxu1 %vm686_vm1, %v5933_v13  ;;  %5512 = vmatprep.mubr.msk.bf16.mxu0 %vm686_vm1, %v6192_v14  ;;  %v6281_v37 = vld [vmem:[%s6162_s26 + $0x188] sm:$0xff]   ;;  %v6287_v39 = vld [vmem:[%s6162_s26 + $0x190] sm:$0xff]   ;;  %v6301_v41 = vld [vmem:[%s6162_s26 + $0x198] sm:$0xff]  }
  0x1f   : > { %5576 = vmatprep.mubr.msk.bf16.mxu1 %vm686_vm1, %v5935_v15  ;;  %v6304_v42 = vld [vmem:[%s6162_s26 + $0xa0] sm:$0xff]   ;;  %v6318_v44 = vld [vmem:[%s6162_s26 + $0xa8] sm:$0xff]   ;;  %v6324_v46 = vld [vmem:[%s6162_s26 + $0xb0] sm:$0xff]  }
  0x20   : > { %v6307_v43 = vld [vmem:[%s6162_s26 + $0x1a0] sm:$0xff]   ;;  %v6321_v45 = vld [vmem:[%s6162_s26 + $0x1a8] sm:$0xff]   ;;  %v6327_v47 = vld [vmem:[%s6162_s26 + $0x1b0] sm:$0xff]  }
  0x21   : > { %v6338_v48 = vld [vmem:[%s6162_s26 + $0xb8] sm:$0xff]   ;;  %v6342_v50 = vld [vmem:[%s6162_s26 + $0xc0] sm:$0xff]   ;;  %v6352_v52 = vld [vmem:[%s6162_s26 + $0xc8] sm:$0xff]  }
  0x22   : > { %v5969_v49 = vld [vmem:[%s6162_s26 + $0x1b8] sm:$0xff]   ;;  %v5971_v51 = vld [vmem:[%s6162_s26 + $0x1c0] sm:$0xff]   ;;  %v5973_v53 = vld [vmem:[%s6162_s26 + $0x1c8] sm:$0xff]  }
  0x23   : > { %v6356_v54 = vld [vmem:[%s6162_s26 + $0xd0] sm:$0xff]   ;;  %v6366_v56 = vld [vmem:[%s6162_s26 + $0xd8] sm:$0xff]   ;;  %v6370_v58 = vld [vmem:[%s6162_s26 + $0xe0] sm:$0xff]  }
  0x24   : > { %v5975_v55 = vld [vmem:[%s6162_s26 + $0x1d0] sm:$0xff]   ;;  %v5977_v57 = vld [vmem:[%s6162_s26 + $0x1d8] sm:$0xff]   ;;  %v5979_v59 = vld [vmem:[%s6162_s26 + $0x1e0] sm:$0xff]  }
  0x25   : > { %5513 = vmatmul.mubr.msk.bf16.gmra.mxu0 %vm686_vm1, %v6202_v16  ;;  %v6380_v60 = vld [vmem:[%s6162_s26 + $0xe8] sm:$0xff]   ;;  %v6384_v62 = vld [vmem:[%s6162_s26 + $0xf0] sm:$0xff]   ;;  %v6394_v0 = vld [vmem:[%s6162_s26 + $0xf8] sm:$0xff]  }
  0x26   : > { %5577 = vmatmul.mubr.msk.bf16.gmra.mxu1 %vm686_vm1, %v5937_v17  ;;  %5516 = vmatprep.mubr.msk.bf16.mxu0 %vm686_vm1, %v6206_v18  ;;  %v5981_v61 = vld [vmem:[%s6162_s26 + $0x1e8] sm:$0xff]   ;;  %v5983_v63 = vld [vmem:[%s6162_s26 + $0x1f0] sm:$0xff]   ;;  %v5985_v1 = vld [vmem:[%s6162_s26 + $0x1f8] sm:$0xff]  }
  0x27   : > { %5580 = vmatprep.mubr.msk.bf16.mxu1 %vm686_vm1, %v5939_v19  ;;  %v6398_v2 = vld [vmem:[%s6162_s26 + $0x100] sm:$0xff]   ;;  %v6408_v5 = vld [vmem:[%s6162_s26 + $0x108] sm:$0xff]   ;;  %v5994_v15 = vld [vmem:[%s6162_s26 + $0x30] sm:$0xff]  }
  0x28   : > { %v5987_v3 = vld [vmem:[%s6162_s26 + $0x200] sm:$0xff]   ;;  %v5989_v7 = vld [vmem:[%s6162_s26 + $0x208] sm:$0xff]   ;;  %v5995_v17 = vld [vmem:[%s6162_s26 + $0x38] sm:$0xff]  }
  0x29   : > { %v5991_v8 = vld [vmem:[%s6162_s26 + $0x20] sm:$0xff]   ;;  %v5993_v11 = vld [vmem:[%s6162_s26 + $0x28] sm:$0xff]  }
  0x2a   : > { %v5990_v9 = vld [vmem:[%s6162_s26] sm:$0xff]   ;;  %v5992_v13 = vld [vmem:[%s6162_s26 + $0x8] sm:$0xff]  }
  0x2b   : > { %v5996_v19 = vld [vmem:[%s6162_s26 + $0x40] sm:$0xff]  }
  0x2d   : > { %5517 = vmatmul.mubr.msk.bf16.gmra.mxu0 %vm686_vm1, %v6216_v20 }
  0x2e   : > { %5581 = vmatmul.mubr.msk.bf16.gmra.mxu1 %vm686_vm1, %v5941_v21  ;;  %5520 = vmatprep.mubr.msk.bf16.mxu0 %vm686_vm1, %v6220_v22  ;;  %v5997_v21 = vld [vmem:[%s6162_s26 + $0x48] sm:$0xff]  }
  0x2f   : > { %5584 = vmatprep.mubr.msk.bf16.mxu1 %vm686_vm1, %v5943_v23  ;;  %v5998_v23 = vld [vmem:[%s6162_s26 + $0x50] sm:$0xff]  }
  0x35   : > { %5521 = vmatmul.mubr.msk.bf16.gmra.mxu0 %vm686_vm1, %v6230_v24 }
  0x36   : > { %5585 = vmatmul.mubr.msk.bf16.gmra.mxu1 %vm686_vm1, %v5945_v25  ;;  %5524 = vmatprep.mubr.msk.bf16.mxu0 %vm686_vm1, %v6234_v26  ;;  %v6009_v25 = vld [vmem:[%s6162_s26 + $0xa8] sm:$0xff]  }
  0x37   : > { %5588 = vmatprep.mubr.msk.bf16.mxu1 %vm686_vm1, %v5947_v27 }
  0x3d   : > { %5525 = vmatmul.mubr.msk.bf16.gmra.mxu0 %vm686_vm1, %v6244_v28 }
  0x3e   : > { %5589 = vmatmul.mubr.msk.bf16.gmra.mxu1 %vm686_vm1, %v5949_v29  ;;  %5528 = vmatprep.mubr.msk.bf16.mxu0 %vm686_vm1, %v6248_v30 }
  0x3f   : > { %5592 = vmatprep.mubr.msk.bf16.mxu1 %vm686_vm1, %v5951_v31 }
  0x45   : > { %5529 = vmatmul.mubr.msk.bf16.gmra.mxu0 %vm686_vm1, %v6258_v32 }
  0x46   : > { %5593 = vmatmul.mubr.msk.bf16.gmra.mxu1 %vm686_vm1, %v6261_v33  ;;  %5532 = vmatprep.mubr.msk.bf16.mxu0 %vm686_vm1, %v6264_v34 }
  0x47   : > { %5596 = vmatprep.mubr.msk.bf16.mxu1 %vm686_vm1, %v6267_v35 }
  0x4d   : > { %5533 = vmatmul.mubr.msk.bf16.gmra.mxu0 %vm686_vm1, %v6278_v36 }
  0x4e   : > { %5597 = vmatmul.mubr.msk.bf16.gmra.mxu1 %vm686_vm1, %v6281_v37  ;;  %5536 = vmatprep.mubr.msk.bf16.mxu0 %vm686_vm1, %v6284_v38 }
  0x4f   : > { %5600 = vmatprep.mubr.msk.bf16.mxu1 %vm686_vm1, %v6287_v39 }
  0x55   : > { %5537 = vmatmul.mubr.msk.bf16.gmra.mxu0 %vm686_vm1, %v6298_v40 }
  0x56   : > { %5601 = vmatmul.mubr.msk.bf16.gmra.mxu1 %vm686_vm1, %v6301_v41  ;;  %5540 = vmatprep.mubr.msk.bf16.mxu0 %vm686_vm1, %v6304_v42 }
  0x57   : > { %5604 = vmatprep.mubr.msk.bf16.mxu1 %vm686_vm1, %v6307_v43 }
  0x5d   : > { %5541 = vmatmul.mubr.msk.bf16.gmra.mxu0 %vm686_vm1, %v6318_v44 }
  0x5e   : > { %5605 = vmatmul.mubr.msk.bf16.gmra.mxu1 %vm686_vm1, %v6321_v45  ;;  %5544 = vmatprep.mubr.msk.bf16.mxu0 %vm686_vm1, %v6324_v46 }
  0x5f   : > { %5608 = vmatprep.mubr.msk.bf16.mxu1 %vm686_vm1, %v6327_v47 }
  0x65   : > { %5545 = vmatmul.mubr.msk.bf16.gmra.mxu0 %vm686_vm1, %v6338_v48 }
  0x66   : > { %5609 = vmatmul.mubr.msk.bf16.gmra.mxu1 %vm686_vm1, %v5969_v49  ;;  %5548 = vmatprep.mubr.msk.bf16.mxu0 %vm686_vm1, %v6342_v50  ;;  %v6012_v49 = vld [vmem:[%s6162_s26 + $0xc0] sm:$0xff]  }
  0x67   : > { %5612 = vmatprep.mubr.msk.bf16.mxu1 %vm686_vm1, %v5971_v51 }
  0x6d   : > { %5549 = vmatmul.mubr.msk.bf16.gmra.mxu0 %vm686_vm1, %v6352_v52 }
  0x6e   : > { %5613 = vmatmul.mubr.msk.bf16.gmra.mxu1 %vm686_vm1, %v5973_v53  ;;  %5552 = vmatprep.mubr.msk.bf16.mxu0 %vm686_vm1, %v6356_v54 }
  0x6f   : > { %5616 = vmatprep.mubr.msk.bf16.mxu1 %vm686_vm1, %v5975_v55 }
  0x75   : > { %5553 = vmatmul.mubr.msk.bf16.gmra.mxu0 %vm686_vm1, %v6366_v56 }
  0x76   : > { %5617 = vmatmul.mubr.msk.bf16.gmra.mxu1 %vm686_vm1, %v5977_v57  ;;  %5556 = vmatprep.mubr.msk.bf16.mxu0 %vm686_vm1, %v6370_v58 }
  0x77   : > { %5620 = vmatprep.mubr.msk.bf16.mxu1 %vm686_vm1, %v5979_v59 }
  0x7d   : > { %5557 = vmatmul.mubr.msk.bf16.gmra.mxu0 %vm686_vm1, %v6380_v60 }
  0x7e   : > { %5621 = vmatmul.mubr.msk.bf16.gmra.mxu1 %vm686_vm1, %v5981_v61  ;;  %5560 = vmatprep.mubr.msk.bf16.mxu0 %vm686_vm1, %v6384_v62  ;;  %v6013_v61 = vld [vmem:[%s6162_s26 + $0xc8] sm:$0xff]  }
  0x7f   : > { %5624 = vmatprep.mubr.msk.bf16.mxu1 %vm686_vm1, %v5983_v63 }
  0x85   : > { %5561 = vmatmul.mubr.msk.bf16.gmra.mxu0 %vm686_vm1, %v6394_v0 }
  0x86   : > { %5625 = vmatmul.mubr.msk.bf16.gmra.mxu1 %vm686_vm1, %v5985_v1  ;;  %5564 = vmatprep.mubr.msk.bf16.mxu0 %vm686_vm1, %v6398_v2  ;;  %v6014_v1 = vld [vmem:[%s6162_s26 + $0xd0] sm:$0xff]  }
  0x87   : > { %5628 = vmatprep.mubr.msk.bf16.mxu1 %vm686_vm1, %v5987_v3 }
  0x8d   : > { %5565 = vmatmul.mubr.msk.bf16.gmra.mxu0 %vm686_vm1, %v6408_v5 }
  0x8e   : > { %5629 = vmatmul.mubr.msk.bf16.gmra.mxu1 %vm686_vm1, %v5989_v7  ;;  %5764 = vmatprep.mubr.msk.bf16.mxu0 %vm686_vm1, %v5991_v8 }
  0x8f   : > { %5634 = vmatprep.mubr.msk.bf16.mxu1 %vm686_vm1, %v5990_v9 }
  0x95   : > { %5765 = vmatmul.mubr.msk.bf16.vlgmr.msra.gmra.mxu0 %vm686_vm1, %v5993_v11 }
  0x96   : > { %5635 = vmatmul.mubr.msk.bf16.vlgmr.msra.gmra.mxu1 %vm686_vm1, %v5992_v13  ;;  %5768 = vmatprep.mubr.msk.bf16.mxu0 %vm686_vm1, %v5994_v15  ;;  %v6015_v13 = vld [vmem:[%s6162_s26 + $0xd8] sm:$0xff]  }
  0x97   : > { %5638 = vmatprep.mubr.msk.bf16.mxu1 %vm686_vm1, %v6165_v4  ;;  %v5999_v4 = vld [vmem:[%s6162_s26 + $0x58] sm:$0xff]  }
  0x9d   : > { %5769 = vmatmul.mubr.msk.bf16.gmra.mxu0 %vm686_vm1, %v5995_v17  ;;  %v6016_v17 = vld [vmem:[%s6162_s26 + $0xe0] sm:$0xff]  }
  0x9e   : > { %5639 = vmatmul.mubr.msk.bf16.gmra.mxu1 %vm686_vm1, %v6171_v6  ;;  %5772 = vmatprep.mubr.msk.bf16.mxu0 %vm686_vm1, %v5996_v19  ;;  %v6000_v6 = vld [vmem:[%s6162_s26 + $0x60] sm:$0xff]  }
  0x9f   : > { %5642 = vmatprep.mubr.msk.bf16.mxu1 %vm686_vm1, %v6180_v10  ;;  %v6001_v10 = vld [vmem:[%s6162_s26 + $0x68] sm:$0xff]  }
  0xa5   : > { %5773 = vmatmul.mubr.msk.bf16.gmra.mxu0 %vm686_vm1, %v5997_v21 }
  0xa6   : > { %5643 = vmatmul.mubr.msk.bf16.gmra.mxu1 %vm686_vm1, %v6188_v12  ;;  %5776 = vmatprep.mubr.msk.bf16.mxu0 %vm686_vm1, %v5998_v23  ;;  %v6002_v12 = vld [vmem:[%s6162_s26 + $0x70] sm:$0xff]  }
  0xa7   : > { %5646 = vmatprep.mubr.msk.bf16.mxu1 %vm686_vm1, %v6192_v14  ;;  %v6003_v14 = vld [vmem:[%s6162_s26 + $0x78] sm:$0xff]  }
  0xad   : > { %5777 = vmatmul.mubr.msk.bf16.gmra.mxu0 %vm686_vm1, %v5999_v4 }
  0xae   : > { %5647 = vmatmul.mubr.msk.bf16.gmra.mxu1 %vm686_vm1, %v6202_v16  ;;  %5780 = vmatprep.mubr.msk.bf16.mxu0 %vm686_vm1, %v6000_v6  ;;  %v6004_v16 = vld [vmem:[%s6162_s26 + $0x80] sm:$0xff]  }
  0xaf   : > { %5650 = vmatprep.mubr.msk.bf16.mxu1 %vm686_vm1, %v6206_v18  ;;  %v6005_v18 = vld [vmem:[%s6162_s26 + $0x88] sm:$0xff]  }
  0xb5   : > { %5781 = vmatmul.mubr.msk.bf16.gmra.mxu0 %vm686_vm1, %v6001_v10  ;;  %v6017_v10 = vld [vmem:[%s6162_s26 + $0xe8] sm:$0xff]  }
  0xb6   : > { %5651 = vmatmul.mubr.msk.bf16.gmra.mxu1 %vm686_vm1, %v6216_v20  ;;  %5784 = vmatprep.mubr.msk.bf16.mxu0 %vm686_vm1, %v6002_v12  ;;  %v6006_v20 = vld [vmem:[%s6162_s26 + $0x90] sm:$0xff]  }
  0xb7   : > { %5654 = vmatprep.mubr.msk.bf16.mxu1 %vm686_vm1, %v6220_v22  ;;  %v6007_v22 = vld [vmem:[%s6162_s26 + $0x98] sm:$0xff]  }
  0xbd   : > { %5785 = vmatmul.mubr.msk.bf16.gmra.mxu0 %vm686_vm1, %v6003_v14  ;;  %v6018_v14 = vld [vmem:[%s6162_s26 + $0xf0] sm:$0xff]  }
  0xbe   : > { %5655 = vmatmul.mubr.msk.bf16.gmra.mxu1 %vm686_vm1, %v6230_v24  ;;  %5788 = vmatprep.mubr.msk.bf16.mxu0 %vm686_vm1, %v6004_v16  ;;  %v6008_v24 = vld [vmem:[%s6162_s26 + $0xa0] sm:$0xff]  }
  0xbf   : > { %5658 = vmatprep.mubr.msk.bf16.mxu1 %vm686_vm1, %v6234_v26  ;;  %v6010_v26 = vld [vmem:[%s6162_s26 + $0xb0] sm:$0xff]  }
  0xc5   : > { %5789 = vmatmul.mubr.msk.bf16.gmra.mxu0 %vm686_vm1, %v6005_v18 }
  0xc6   : > { %5659 = vmatmul.mubr.msk.bf16.gmra.mxu1 %vm686_vm1, %v6244_v28  ;;  %5792 = vmatprep.mubr.msk.bf16.mxu0 %vm686_vm1, %v6006_v20 }
  0xc7   : > { %5662 = vmatprep.mubr.msk.bf16.mxu1 %vm686_vm1, %v6248_v30 }
  0xcd   : > { %5793 = vmatmul.mubr.msk.bf16.gmra.mxu0 %vm686_vm1, %v6007_v22 }
  0xce   : > { %5663 = vmatmul.mubr.msk.bf16.gmra.mxu1 %vm686_vm1, %v6258_v32  ;;  %5796 = vmatprep.mubr.msk.bf16.mxu0 %vm686_vm1, %v6008_v24  ;;  %v6011_v32 = vld [vmem:[%s6162_s26 + $0xb8] sm:$0xff]  }
  0xcf   : > { %5666 = vmatprep.mubr.msk.bf16.mxu1 %vm686_vm1, %v6264_v34 }
  0xd5   : > { %v6484_v27 = vpop.f32.mrf.mxu0  ;;  %5797 = vmatmul.mubr.msk.bf16.gmra.mxu0 %vm686_vm1, %v6009_v25  ;;  %v6019_v25 = vld [vmem:[%s6162_s26 + $0xf8] sm:$0xff]  }
  0xd6   : > { %v6487_v28 = vpop.f32.mrf.mxu1  ;;  %5667 = vmatmul.mubr.msk.bf16.gmra.mxu1 %vm686_vm1, %v6278_v36  ;;  %5800 = vmatprep.mubr.msk.bf16.mxu0 %vm686_vm1, %v6010_v26 }
  0xd7   : > { %7275 = vst [vmem:[#allocation2_spill] sm:$0xff] %v6487_v28  ;;  %v6492_v29 = vpop.f32.mrf.mxu0  ;;  %5670 = vmatprep.mubr.msk.bf16.mxu1 %vm686_vm1, %v6284_v38 }
  0xd8   : > { %v6496_v30 = vpop.f32.mrf.mxu1 }
  0xd9   : > { %7276 = vst [vmem:[#allocation3_spill] sm:$0xff] %v6496_v30  ;;  %v6498_v31 = vpop.f32.mrf.mxu0 }
  0xda   : > { %v6501_v34 = vpop.f32.mrf.mxu1 }
  0xdb   : > { %7277 = vst [vmem:[#allocation4_spill] sm:$0xff] %v6501_v34  ;;  %v6504_v51 = vpop.f32.mrf.mxu0  ;;  %v6033_v34 = vld [vmem:[%s6162_s26 + $0x168] sm:$0xff]  }
  0xdc   : > { %v6506_v36 = vpop.f32.mrf.mxu1 }
  0xdd   : > { %7278 = vst [vmem:[#allocation5_spill] sm:$0xff] %v6506_v36  ;;  %v6508_v53 = vpop.f32.mrf.mxu0  ;;  %5801 = vmatmul.mubr.msk.bf16.gmra.mxu0 %vm686_vm1, %v6011_v32  ;;  %v6020_v32 = vld [vmem:[%s6162_s26 + $0x100] sm:$0xff]  }
  0xde   : > { %v6511_v55 = vpop.f32.mrf.mxu1  ;;  %5671 = vmatmul.mubr.msk.bf16.gmra.mxu1 %vm686_vm1, %v6298_v40  ;;  %5804 = vmatprep.mubr.msk.bf16.mxu0 %vm686_vm1, %v6012_v49 }
  0xdf   : > { %7279 = vst [vmem:[#allocation6_spill] sm:$0xff] %v6511_v55  ;;  %v6516_v38 = vpop.f32.mrf.mxu0  ;;  %5674 = vmatprep.mubr.msk.bf16.mxu1 %vm686_vm1, %v6304_v42 }
  0xe0   : > { %v6520_v57 = vpop.f32.mrf.mxu1 }
  0xe1   : > { %7280 = vst [vmem:[#allocation7_spill] sm:$0xff] %v6520_v57  ;;  %v6522_v59 = vpop.f32.mrf.mxu0 }
  0xe2   : > { %v6525_v63 = vpop.f32.mrf.mxu1 }
  0xe3   : > { %7281 = vst [vmem:[#allocation8_spill] sm:$0xff] %v6525_v63  ;;  %v6528_v3 = vpop.f32.mrf.mxu0  ;;  %v6031_v63 = vld [vmem:[%s6162_s26 + $0x158] sm:$0xff]  }
  0xe4   : > { %v6530_v40 = vpop.f32.mrf.mxu1 }
  0xe5   : > { %7282 = vst [vmem:[#allocation9_spill] sm:$0xff] %v6530_v40  ;;  %v6532_v7 = vpop.f32.mrf.mxu0  ;;  %5805 = vmatmul.mubr.msk.bf16.gmra.mxu0 %vm686_vm1, %v6013_v61 }
  0xe6   : > { %v6535_v8 = vpop.f32.mrf.mxu1  ;;  %5675 = vmatmul.mubr.msk.bf16.gmra.mxu1 %vm686_vm1, %v6318_v44  ;;  %5808 = vmatprep.mubr.msk.bf16.mxu0 %vm686_vm1, %v6014_v1 }
  0xe7   : > { %7283 = vst [vmem:[#allocation10_spill] sm:$0xff] %v6535_v8  ;;  %v6540_v42 = vpop.f32.mrf.mxu0  ;;  %5678 = vmatprep.mubr.msk.bf16.mxu1 %vm686_vm1, %v6324_v46 }
  0xe8   : > { %v6544_v9 = vpop.f32.mrf.mxu1 }
  0xe9   : > { %7284 = vst [vmem:[#allocation11_spill] sm:$0xff] %v6544_v9  ;;  %v6546_v11 = vpop.f32.mrf.mxu0 }
  0xea   : > { %v6549_v15 = vpop.f32.mrf.mxu1 }
  0xeb   : > { %7285 = vst [vmem:[#allocation12_spill] sm:$0xff] %v6549_v15  ;;  %v6552_v19 = vpop.f32.mrf.mxu0  ;;  %v6029_v15 = vld [vmem:[%s6162_s26 + $0x148] sm:$0xff]  }
  0xec   : > { %v6554_v44 = vpop.f32.mrf.mxu1 }
  0xed   : > { %7286 = vst [vmem:[#allocation13_spill] sm:$0xff] %v6554_v44  ;;  %v6556_v21 = vpop.f32.mrf.mxu0  ;;  %5809 = vmatmul.mubr.msk.bf16.gmra.mxu0 %vm686_vm1, %v6015_v13 }
  0xee   : > { %v6559_v23 = vpop.f32.mrf.mxu1  ;;  %5679 = vmatmul.mubr.msk.bf16.gmra.mxu1 %vm686_vm1, %v6338_v48  ;;  %5812 = vmatprep.mubr.msk.bf16.mxu0 %vm686_vm1, %v6016_v17 }
  0xef   : > { %7287 = vst [vmem:[#allocation14_spill] sm:$0xff] %v6559_v23  ;;  %v6564_v46 = vpop.f32.mrf.mxu0  ;;  %5682 = vmatprep.mubr.msk.bf16.mxu1 %vm686_vm1, %v6342_v50 }
  0xf0   : > { %v6568_v4 = vpop.f32.mrf.mxu1 }
  0xf1   : > { %7288 = vst [vmem:[#allocation15_spill] sm:$0xff] %v6568_v4  ;;  %v6570_v6 = vpop.f32.mrf.mxu0 }
  0xf2   : > { %v6573_v12 = vpop.f32.mrf.mxu1 }
  0xf3   : > { %7289 = vst [vmem:[#allocation16_spill] sm:$0xff] %v6573_v12  ;;  %v6576_v16 = vpop.f32.mrf.mxu0  ;;  %v6027_v12 = vld [vmem:[%s6162_s26 + $0x138] sm:$0xff]  }
  0xf4   : > { %v6578_v48 = vpop.f32.mrf.mxu1 }
  0xf5   : > { %7290 = vst [vmem:[#allocation17_spill] sm:$0xff] %v6578_v48  ;;  %v6580_v18 = vpop.f32.mrf.mxu0  ;;  %5813 = vmatmul.mubr.msk.bf16.gmra.mxu0 %vm686_vm1, %v6017_v10  ;;  %v6021_v10 = vld [vmem:[%s6162_s26 + $0x108] sm:$0xff]  }
  0xf6   : > { %v6583_v20 = vpop.f32.mrf.mxu1  ;;  %5683 = vmatmul.mubr.msk.bf16.gmra.mxu1 %vm686_vm1, %v6352_v52  ;;  %5816 = vmatprep.mubr.msk.bf16.mxu0 %vm686_vm1, %v6018_v14 }
  0xf7   : > { %7291 = vst [vmem:[#allocation18_spill] sm:$0xff] %v6583_v20  ;;  %v6588_v50 = vpop.f32.mrf.mxu0  ;;  %5686 = vmatprep.mubr.msk.bf16.mxu1 %vm686_vm1, %v6356_v54 }
  0xf8   : > { %v6592_v22 = vpop.f32.mrf.mxu1 }
  0xf9   : > { %7292 = vst [vmem:[#allocation19_spill] sm:$0xff] %v6592_v22  ;;  %v6594_v24 = vpop.f32.mrf.mxu0 }
  0xfa   : > { %v6597_v26 = vpop.f32.mrf.mxu1 }
  0xfb   : > { %7293 = vst [vmem:[#allocation20_spill] sm:$0xff] %v6597_v26  ;;  %v6600_v49 = vpop.f32.mrf.mxu0 }
  0xfc   : > { %v6602_v52 = vpop.f32.mrf.mxu1 }
  0xfd   : > { %7294 = vst [vmem:[#allocation21_spill] sm:$0xff] %v6602_v52  ;;  %v6604_v61 = vpop.f32.mrf.mxu0  ;;  %5817 = vmatmul.mubr.msk.bf16.gmra.mxu0 %vm686_vm1, %v6019_v25  ;;  %v6022_v25 = vld [vmem:[%s6162_s26 + $0x110] sm:$0xff]  }
  0xfe   : > { %v6607_v1 = vpop.f32.mrf.mxu1  ;;  %5687 = vmatmul.mubr.msk.bf16.gmra.mxu1 %vm686_vm1, %v6366_v56  ;;  %5820 = vmatprep.mubr.msk.bf16.mxu0 %vm686_vm1, %v6020_v32 }
  0xff   : > { %7295 = vst [vmem:[#allocation22_spill] sm:$0xff] %v6607_v1  ;;  %v6612_v54 = vpop.f32.mrf.mxu0  ;;  %5690 = vmatprep.mubr.msk.bf16.mxu1 %vm686_vm1, %v6370_v58 }
 0x100   : > { %v6616_v13 = vpop.f32.mrf.mxu1 }
 0x101   : > { %7296 = vst [vmem:[#allocation23_spill] sm:$0xff] %v6616_v13  ;;  %v6618_v17 = vpop.f32.mrf.mxu0  ;;  %v6023_v13 = vld [vmem:[%s6162_s26 + $0x118] sm:$0xff]  }
 0x102   : > { %v6621_v14 = vpop.f32.mrf.mxu1 }
 0x103   : > { %7297 = vst [vmem:[#allocation24_spill] sm:$0xff] %v6621_v14  ;;  %v6624_v1 = vpop.f32.mrf.mxu0 }
 0x104   : > { %v6626_v56 = vpop.f32.mrf.mxu1 }
 0x105   : > { %7298 = vst [vmem:[#allocation25_spill] sm:$0xff] %v6626_v56  ;;  %v6628_v32 = vpop.f32.mrf.mxu0  ;;  %5821 = vmatmul.mubr.msk.bf16.gmra.mxu0 %vm686_vm1, %v6021_v10 }
 0x106   : > { %v6631_v52 = vpop.f32.mrf.mxu1  ;;  %5691 = vmatmul.mubr.msk.bf16.gmra.mxu1 %vm686_vm1, %v6380_v60  ;;  %5824 = vmatprep.mubr.msk.bf16.mxu0 %vm686_vm1, %v6022_v25 }
 0x107   : > { %7299 = vst [vmem:[#allocation26_spill] sm:$0xff] %v6631_v52  ;;  %v6636_v58 = vpop.f32.mrf.mxu0  ;;  %5694 = vmatprep.mubr.msk.bf16.mxu1 %vm686_vm1, %v6384_v62  ;;  %v6024_v52 = vld [vmem:[%s6162_s26 + $0x120] sm:$0xff]  }
 0x108   : > { %v6640_v14 = vpop.f32.mrf.mxu1 }
 0x109   : > { %7300 = vst [vmem:[#allocation27_spill] sm:$0xff] %v6640_v14  ;;  %v6642_v56 = vpop.f32.mrf.mxu0  ;;  %v6025_v14 = vld [vmem:[%s6162_s26 + $0x128] sm:$0xff]  }
 0x10a   : > { %v6645_v10 = vpop.f32.mrf.mxu1 }
 0x10b   : > { %7301 = vst [vmem:[#allocation28_spill] sm:$0xff] %v6645_v10  ;;  %v6648_v26 = vpop.f32.mrf.mxu0 }
 0x10c   : > { %v6650_v60 = vpop.f32.mrf.mxu1 }
 0x10d   : > { %7302 = vst [vmem:[#allocation29_spill] sm:$0xff] %v6650_v60  ;;  %v6652_v25 = vpop.f32.mrf.mxu0  ;;  %5825 = vmatmul.mubr.msk.bf16.gmra.mxu0 %vm686_vm1, %v6023_v13 }
 0x10e   : > { %v6655_v22 = vpop.f32.mrf.mxu1  ;;  %5695 = vmatmul.mubr.msk.bf16.gmra.mxu1 %vm686_vm1, %v6394_v0  ;;  %5828 = vmatprep.mubr.msk.bf16.mxu0 %vm686_vm1, %v6024_v52 }
 0x10f   : > { %7303 = vst [vmem:[#allocation30_spill] sm:$0xff] %v6655_v22  ;;  %v6660_v62 = vpop.f32.mrf.mxu0  ;;  %5698 = vmatprep.mubr.msk.bf16.mxu1 %vm686_vm1, %v6398_v2  ;;  %v6026_v22 = vld [vmem:[%s6162_s26 + $0x130] sm:$0xff]  }
 0x110   : > { %v6664_v10 = vpop.f32.mrf.mxu1 }
 0x111   : > { %7304 = vst [vmem:[#allocation31_spill] sm:$0xff] %v6664_v10  ;;  %v6666_v60 = vpop.f32.mrf.mxu0 }
 0x112   : > { %v6669_v13 = vpop.f32.mrf.mxu1 }
 0x113   : > { %7305 = vst [vmem:[#allocation32_spill] sm:$0xff] %v6669_v13  ;;  %v6672_v20 = vpop.f32.mrf.mxu0  ;;  %v6056_v13 = vld [vmem:[%s6162_s26 + $0x110] sm:$0xff]  }
 0x114   : > { %v6674_v0 = vpop.f32.mrf.mxu1 }
 0x115   : > { %7306 = vst [vmem:[#allocation33_spill] sm:$0xff] %v6674_v0  ;;  %v6676_v52 = vpop.f32.mrf.mxu0  ;;  %5829 = vmatmul.mubr.msk.bf16.gmra.mxu0 %vm686_vm1, %v6025_v14 }
 0x116   : > { %v6679_v48 = vpop.f32.mrf.mxu1  ;;  %5699 = vmatmul.mubr.msk.bf16.gmra.mxu1 %vm686_vm1, %v6408_v5  ;;  %5832 = vmatprep.mubr.msk.bf16.mxu0 %vm686_vm1, %v6026_v22 }
 0x117   : > { %7307 = vst [vmem:[#allocation34_spill] sm:$0xff] %v6679_v48  ;;  %v6684_v2 = vpop.f32.mrf.mxu0  ;;  %5702 = vmatprep.mubr.msk.bf16.mxu1 %vm686_vm1, %v6056_v13  ;;  %v6028_v48 = vld [vmem:[%s6162_s26 + $0x140] sm:$0xff]   ;;  %v6057_v13 = vld [vmem:[%s6162_s26 + $0x118] sm:$0xff]  }
 0x118   : > { %v6688_v10 = vpop.f32.mrf.mxu1 }
 0x119   : > { %7308 = vst [vmem:[#allocation35_spill] sm:$0xff] %v6688_v10  ;;  %v6690_v0 = vpop.f32.mrf.mxu0 }
 0x11a   : > { %v6693_v14 = vpop.f32.mrf.mxu1 }
 0x11b   : > { %7309 = vst [vmem:[#allocation36_spill] sm:$0xff] %v6693_v14  ;;  %v6696_v4 = vpop.f32.mrf.mxu0  ;;  %v6058_v14 = vld [vmem:[%s6162_s26 + $0x120] sm:$0xff]  }
 0x11c   : > { %v6698_v5 = vpop.f32.mrf.mxu1 }
 0x11d   : > { %7310 = vst [vmem:[#allocation37_spill] sm:$0xff] %v6698_v5  ;;  %v6700_v22 = vpop.f32.mrf.mxu0  ;;  %5833 = vmatmul.mubr.msk.bf16.gmra.mxu0 %vm686_vm1, %v6027_v12 }
 0x11e   : > { %v6703_v23 = vpop.f32.mrf.mxu1  ;;  %5703 = vmatmul.mubr.msk.bf16.gmra.mxu1 %vm686_vm1, %v6057_v13  ;;  %5836 = vmatprep.mubr.msk.bf16.mxu0 %vm686_vm1, %v6028_v48 }
 0x11f   : > { %7311 = vst [vmem:[#allocation38_spill] sm:$0xff] %v6703_v23  ;;  %v6708_v10 = vpop.f32.mrf.mxu0  ;;  %5706 = vmatprep.mubr.msk.bf16.mxu1 %vm686_vm1, %v6058_v14  ;;  %v6030_v23 = vld [vmem:[%s6162_s26 + $0x150] sm:$0xff]   ;;  %v6059_v14 = vld [vmem:[%s6162_s26 + $0x128] sm:$0xff]  }
 0x120   : > { %v6712_v44 = vpop.f32.mrf.mxu1 }
 0x121   : > { %7312 = vst [vmem:[#allocation39_spill] sm:$0xff] %v6712_v44  ;;  %v6714_v5 = vpop.f32.mrf.mxu0 }
 0x122   : > { %v6717_v12 = vpop.f32.mrf.mxu1 }
 0x123   : > { %7313 = vst [vmem:[#allocation40_spill] sm:$0xff] %v6717_v12  ;;  %v6720_v9 = vpop.f32.mrf.mxu0  ;;  %v6060_v12 = vld [vmem:[%s6162_s26 + $0x130] sm:$0xff]  }
 0x124   : > { %v6722_v13 = vpop.f32.mrf.mxu1 }
 0x125   : > { %7314 = vst [vmem:[#allocation41_spill] sm:$0xff] %v6722_v13  ;;  %v6724_v48 = vpop.f32.mrf.mxu0  ;;  %5837 = vmatmul.mubr.msk.bf16.gmra.mxu0 %vm686_vm1, %v6029_v15 }
 0x126   : > { %v6727_v8 = vpop.f32.mrf.mxu1  ;;  %5707 = vmatmul.mubr.msk.bf16.gmra.mxu1 %vm686_vm1, %v6059_v14  ;;  %5840 = vmatprep.mubr.msk.bf16.mxu0 %vm686_vm1, %v6030_v23 }
 0x127   : > { %7315 = vst [vmem:[#allocation42_spill] sm:$0xff] %v6727_v8  ;;  %v6732_v44 = vpop.f32.mrf.mxu0  ;;  %5710 = vmatprep.mubr.msk.bf16.mxu1 %vm686_vm1, %v6060_v12  ;;  %v6032_v8 = vld [vmem:[%s6162_s26 + $0x160] sm:$0xff]   ;;  %v6061_v12 = vld [vmem:[%s6162_s26 + $0x138] sm:$0xff]  }
 0x128   : > { %v6736_v40 = vpop.f32.mrf.mxu1 }
 0x129   : > { %7316 = vst [vmem:[#allocation43_spill] sm:$0xff] %v6736_v40  ;;  %v6738_v13 = vpop.f32.mrf.mxu0 }
 0x12a   : > { %v6741_v15 = vpop.f32.mrf.mxu1 }
 0x12b   : > { %7317 = vst [vmem:[#allocation44_spill] sm:$0xff] %v6741_v15  ;;  %v6744_v57 = vpop.f32.mrf.mxu0  ;;  %v6062_v15 = vld [vmem:[%s6162_s26 + $0x140] sm:$0xff]  }
 0x12c   : > { %v6746_v14 = vpop.f32.mrf.mxu1 }
 0x12d   : > { %7318 = vst [vmem:[#allocation45_spill] sm:$0xff] %v6746_v14  ;;  %v6748_v23 = vpop.f32.mrf.mxu0  ;;  %5841 = vmatmul.mubr.msk.bf16.gmra.mxu0 %vm686_vm1, %v6031_v63 }
 0x12e   : > { %7319 = vst [vmem:[#allocation46_spill] sm:$0xff] %v6748_v23  ;;  %v6751_v55 = vpop.f32.mrf.mxu1  ;;  %5711 = vmatmul.mubr.msk.bf16.gmra.mxu1 %vm686_vm1, %v6061_v12  ;;  %5844 = vmatprep.mubr.msk.bf16.mxu0 %vm686_vm1, %v6032_v8 }
 0x12f   : > { %7320 = vst [vmem:[#allocation47_spill] sm:$0xff] %v6751_v55  ;;  %v6756_v40 = vpop.f32.mrf.mxu0  ;;  %5714 = vmatprep.mubr.msk.bf16.mxu1 %vm686_vm1, %v6062_v15  ;;  %v6034_v55 = vld [vmem:[%s6162_s26 + $0x170] sm:$0xff]   ;;  %v6063_v15 = vld [vmem:[%s6162_s26 + $0x148] sm:$0xff]  }
 0x130   : > { %7321 = vst [vmem:[#allocation48_spill] sm:$0xff] %v6756_v40  ;;  %v6760_v36 = vpop.f32.mrf.mxu1 }
 0x131   : > { %7322 = vst [vmem:[#allocation49_spill] sm:$0xff] %v6760_v36  ;;  %v6762_v14 = vpop.f32.mrf.mxu0 }
 0x132   : > { %7323 = vst [vmem:[#allocation50_spill] sm:$0xff] %v6762_v14  ;;  %v6765_v63 = vpop.f32.mrf.mxu1 }
 0x133   : > { %7324 = vst [vmem:[#allocation51_spill] sm:$0xff] %v6765_v63  ;;  %v6768_v30 = vpop.f32.mrf.mxu0  ;;  %v6064_v63 = vld [vmem:[%s6162_s26 + $0x150] sm:$0xff]  }
 0x134   : > { %7325 = vst [vmem:[#allocation52_spill] sm:$0xff] %v6768_v30  ;;  %v6770_v12 = vpop.f32.mrf.mxu1 }
 0x135   : > { %7326 = vst [vmem:[#allocation53_spill] sm:$0xff] %v6770_v12  ;;  %v6772_v8 = vpop.f32.mrf.mxu0  ;;  %5845 = vmatmul.mubr.msk.bf16.gmra.mxu0 %vm686_vm1, %v6033_v34 }
 0x136   : > { %7327 = vst [vmem:[#allocation54_spill] sm:$0xff] %v6772_v8  ;;  %v6775_v28 = vpop.f32.mrf.mxu1  ;;  %5715 = vmatmul.mubr.msk.bf16.gmra.mxu1 %vm686_vm1, %v6063_v15  ;;  %5848 = vmatprep.mubr.msk.bf16.mxu0 %vm686_vm1, %v6034_v55  ;;  %v6035_v8 = vld [vmem:[%s6162_s26 + $0x178] sm:$0xff]  }
 0x137   : > { %7328 = vst [vmem:[#allocation55_spill] sm:$0xff] %v6775_v28  ;;  %v6780_v36 = vpop.f32.mrf.mxu0  ;;  %5718 = vmatprep.mubr.msk.bf16.mxu1 %vm686_vm1, %v6064_v63  ;;  %v6036_v28 = vld [vmem:[%s6162_s26 + $0x180] sm:$0xff]   ;;  %v6065_v63 = vld [vmem:[%s6162_s26 + $0x158] sm:$0xff]  }
 0x138   : > { %7329 = vst [vmem:[#allocation56_spill] sm:$0xff] %v6780_v36  ;;  %v6784_v30 = vpop.f32.mrf.mxu1 }
 0x139   : > { %7330 = vst [vmem:[#allocation57_spill] sm:$0xff] %v6784_v30  ;;  %v6786_v12 = vpop.f32.mrf.mxu0 }
 0x13a   : > { %7331 = vst [vmem:[#allocation58_spill] sm:$0xff] %v6786_v12  ;;  %v6789_v34 = vpop.f32.mrf.mxu1 }
 0x13b   : > { %7332 = vst [vmem:[#allocation59_spill] sm:$0xff] %v6789_v34  ;;  %v6792_v14 = vpop.f32.mrf.mxu0  ;;  %v6066_v34 = vld [vmem:[%s6162_s26 + $0x160] sm:$0xff]  }
 0x13c   : > { %7333 = vst [vmem:[#allocation60_spill] sm:$0xff] %v6792_v14  ;;  %v6794_v15 = vpop.f32.mrf.mxu1 }
 0x13d   : > { %7334 = vst [vmem:[#allocation61_spill] sm:$0xff] %v6794_v15  ;;  %v6796_v55 = vpop.f32.mrf.mxu0  ;;  %5849 = vmatmul.mubr.msk.bf16.gmra.mxu0 %vm686_vm1, %v6035_v8 }
 0x13e   : > { %7335 = vst [vmem:[#allocation62_spill] sm:$0xff] %v6796_v55  ;;  %v6799_v36 = vpop.f32.mrf.mxu1  ;;  %5719 = vmatmul.mubr.msk.bf16.gmra.mxu1 %vm686_vm1, %v6065_v63  ;;  %5852 = vmatprep.mubr.msk.bf16.mxu0 %vm686_vm1, %v6036_v28  ;;  %v6037_v55 = vld [vmem:[%s6162_s26 + $0x188] sm:$0xff]  }
 0x13f   : > { %7336 = vst [vmem:[#allocation63_spill] sm:$0xff] %v6799_v36  ;;  %v6804_v30 = vpop.f32.mrf.mxu0  ;;  %5722 = vmatprep.mubr.msk.bf16.mxu1 %vm686_vm1, %v6066_v34  ;;  %v6038_v36 = vld [vmem:[%s6162_s26 + $0x190] sm:$0xff]   ;;  %v6067_v34 = vld [vmem:[%s6162_s26 + $0x168] sm:$0xff]  }
 0x140   : > { %7337 = vst [vmem:[#allocation64_spill] sm:$0xff] %v6804_v30  ;;  %v6808_v14 = vpop.f32.mrf.mxu1 }
 0x141   : > { %7338 = vst [vmem:[#allocation65_spill] sm:$0xff] %v6808_v14  ;;  %v6810_v15 = vpop.f32.mrf.mxu0 }
 0x142   : > { %7339 = vst [vmem:[#allocation66_spill] sm:$0xff] %v6810_v15  ;;  %v6813_v8 = vpop.f32.mrf.mxu1 }
 0x143   : > { %7340 = vst [vmem:[#allocation67_spill] sm:$0xff] %v6813_v8  ;;  %v6816_v12 = vpop.f32.mrf.mxu0  ;;  %v6068_v8 = vld [vmem:[%s6162_s26 + $0x170] sm:$0xff]  }
 0x144   : > { %7341 = vst [vmem:[#allocation68_spill] sm:$0xff] %v6816_v12  ;;  %v6818_v63 = vpop.f32.mrf.mxu1 }
 0x145   : > { %7342 = vst [vmem:[#allocation69_spill] sm:$0xff] %v6818_v63  ;;  %v6820_v28 = vpop.f32.mrf.mxu0  ;;  %5853 = vmatmul.mubr.msk.bf16.gmra.mxu0 %vm686_vm1, %v6037_v55 }
 0x146   : > { %7343 = vst [vmem:[#allocation70_spill] sm:$0xff] %v6820_v28  ;;  %v6823_v30 = vpop.f32.mrf.mxu1  ;;  %5723 = vmatmul.mubr.msk.bf16.gmra.mxu1 %vm686_vm1, %v6067_v34  ;;  %5856 = vmatprep.mubr.msk.bf16.mxu0 %vm686_vm1, %v6038_v36  ;;  %v6039_v28 = vld [vmem:[%s6162_s26 + $0x198] sm:$0xff]  }
 0x147   : > { %7344 = vst [vmem:[#allocation71_spill] sm:$0xff] %v6823_v30  ;;  %v6828_v14 = vpop.f32.mrf.mxu0  ;;  %5726 = vmatprep.mubr.msk.bf16.mxu1 %vm686_vm1, %v6068_v8  ;;  %v6040_v30 = vld [vmem:[%s6162_s26 + $0x1a0] sm:$0xff]  }
 0x148   : > { %7345 = vst [vmem:[#allocation72_spill] sm:$0xff] %v6828_v14  ;;  %v6832_v15 = vpop.f32.mrf.mxu1 }
 0x149   : > { %7346 = vst [vmem:[#allocation73_spill] sm:$0xff] %v6832_v15  ;;  %v6834_v63 = vpop.f32.mrf.mxu0 }
 0x14a   : > { %7347 = vst [vmem:[#allocation74_spill] sm:$0xff] %v6834_v63  ;;  %v6837_v55 = vpop.f32.mrf.mxu1 }
 0x14b   : > { %7348 = vst [vmem:[#allocation75_spill] sm:$0xff] %v6837_v55  ;;  %v6840_v12 = vpop.f32.mrf.mxu0 }
 0x14c   : > { %7349 = vst [vmem:[#allocation76_spill] sm:$0xff] %v6840_v12  ;;  %v6842_v34 = vpop.f32.mrf.mxu1 }
 0x14d   : > { %7350 = vst [vmem:[#allocation77_spill] sm:$0xff] %v6842_v34  ;;  %v6844_v36 = vpop.f32.mrf.mxu0  ;;  %5857 = vmatmul.mubr.msk.bf16.gmra.mxu0 %vm686_vm1, %v6039_v28  ;;  %v6041_v34 = vld [vmem:[%s6162_s26 + $0x1a8] sm:$0xff]   ;;  %v6042_v28 = vld [vmem:[%s6162_s26 + $0x1b0] sm:$0xff]  }
 0x14e   : > { %7351 = vst [vmem:[#allocation78_spill] sm:$0xff] %v6844_v36  ;;  %v6847_v8 = vpop.f32.mrf.mxu1  ;;  %5727 = vmatmul.mubr.msk.bf16.gmra.mxu1 %vm686_vm1, %v6261_v33  ;;  %5860 = vmatprep.mubr.msk.bf16.mxu0 %vm686_vm1, %v6040_v30 }
 0x14f   : > { %7352 = vst [vmem:[#allocation79_spill] sm:$0xff] %v6847_v8  ;;  %v6852_v15 = vpop.f32.mrf.mxu0  ;;  %5730 = vmatprep.mubr.msk.bf16.mxu1 %vm686_vm1, %v6267_v35 }
 0x150   : > { %7353 = vst [vmem:[#allocation80_spill] sm:$0xff] %v6852_v15  ;;  %v6856_v55 = vpop.f32.mrf.mxu1  ;;  %v6043_v15 = vld [vmem:[%s6162_s26 + $0x1b8] sm:$0xff]  }
 0x151   : > { %7354 = vst [vmem:[#allocation81_spill] sm:$0xff] %v6856_v55  ;;  %v6858_v12 = vpop.f32.mrf.mxu0 }
 0x152   : > { %7355 = vst [vmem:[#allocation82_spill] sm:$0xff] %v6858_v12  ;;  %v6861_v36 = vpop.f32.mrf.mxu1 }
 0x153   : > { %7356 = vst [vmem:[#allocation83_spill] sm:$0xff] %v6861_v36  ;;  %v6864_v63 = vpop.f32.mrf.mxu0 }
 0x154   : > { %7357 = vst [vmem:[#allocation84_spill] sm:$0xff] %v6864_v63  ;;  %v6866_v8 = vpop.f32.mrf.mxu1 }
 0x155   : > { %7358 = vst [vmem:[#allocation85_spill] sm:$0xff] %v6866_v8  ;;  %v5766_v33 = vpop.f32.mrf.mxu0  ;;  %5861 = vmatmul.mubr.msk.bf16.gmra.mxu0 %vm686_vm1, %v6041_v34  ;;  %v6881_v34 = vld [vmem:[%s7273_s2] ss:$0 sm:$0xff] }
 0x156   : > { %v5636_v30 = vpop.f32.mrf.mxu1  ;;  %5731 = vmatmul.mubr.msk.bf16.gmra.mxu1 %vm686_vm1, %v6281_v37  ;;  %5864 = vmatprep.mubr.msk.bf16.mxu0 %vm686_vm1, %v6042_v28  ;;  %v6044_v28 = vld [vmem:[%s6162_s26 + $0x1c0] sm:$0xff]  }
 0x157   : > { %v1495_v35 = vadd.f32 %v5636_v30, %v6484_v27  ;;  %v2682_v36 = vpop.f32.mrf.mxu0  ;;  %5734 = vmatprep.mubr.msk.bf16.mxu1 %vm686_vm1, %v6287_v39 }
 0x158   : > { %v1486_v55 = vpop.f32.mrf.mxu1 }
 0x159   : > { %v3195_v8 = vadd.f32 %v5766_v33, %v1495_v35  ;;  %v1487_v63 = vadd.f32 %v1486_v55, %v6492_v29  ;;  %v5767_v12 = vpop.f32.mrf.mxu0 }
 0x15a   : > { %v5637_v37 = vpop.f32.mrf.mxu1 }
 0x15b   : > { %v3193_v14 = vadd.f32 %v2682_v36, %v1487_v63  ;;  %v1498_v27 = vadd.f32 %v5637_v37, %v6498_v31  ;;  %v2685_v30 = vpop.f32.mrf.mxu0  ;;  %v3330_v39 = vadd.f32 %v6881_v34, %v3195_v8 }
 0x15c   : > { %v1489_v40 = vpop.f32.mrf.mxu1 }
 0x15d   : > { %v3196_v33 = vadd.f32 %v5767_v12, %v1498_v27  ;;  %v1490_v29 = vadd.f32 %v1489_v40, %v6504_v51  ;;  %v5770_v55 = vpop.f32.mrf.mxu0  ;;  %5865 = vmatmul.mubr.msk.bf16.gmra.mxu0 %vm686_vm1, %v6043_v15  ;;  %v3328_v31 = vadd.f32 %v6881_v34, %v3193_v14  ;;  %v3458_v15 = vmax.f32 %v3330_v39, 0.0  ;;  %v6045_v14 = vld [vmem:[%s6162_s26 + $0x1c8] sm:$0xff]  }
 0x15e   : > { %v5640_v35 = vpop.f32.mrf.mxu1  ;;  %5735 = vmatmul.mubr.msk.bf16.gmra.mxu1 %vm686_vm1, %v6301_v41  ;;  %5868 = vmatprep.mubr.msk.bf16.mxu0 %vm686_vm1, %v6044_v28 }
 0x15f   : > { %v3331_v63 = vadd.f32 %v6881_v34, %v3196_v33  ;;  %v3194_v36 = vadd.f32 %v2685_v30, %v1490_v29  ;;  %v1511_v12 = vadd.f32 %v5640_v35, %v6508_v53  ;;  %v2698_v51 = vpop.f32.mrf.mxu0  ;;  %5738 = vmatprep.mubr.msk.bf16.mxu1 %vm686_vm1, %v6307_v43  ;;  %v6046_v30 = vld [vmem:[%s6162_s26 + $0x1d0] sm:$0xff]   ;;  %v3456_v33 = vmax.f32 %v3328_v31, 0.0 }
 0x160   : > { %v1502_v40 = vpop.f32.mrf.mxu1 }
 0x161   : > { %v3459_v8 = vmax.f32 %v3331_v63, 0.0  ;;  %v3329_v41 = vadd.f32 %v6881_v34, %v3194_v36  ;;  %v1503_v37 = vadd.f32 %v1502_v40, %v6516_v38  ;;  %v5771_v28 = vpop.f32.mrf.mxu0  ;;  %v3199_v53 = vadd.f32 %v5770_v55, %v1511_v12 }
 0x162   : > { %v5641_v27 = vpop.f32.mrf.mxu1 }
 0x163   : > { %v4932_v43 = vpack.c.bf16 %v3459_v8, %v3458_v15  ;;  %v3457_v39 = vmax.f32 %v3329_v41, 0.0  ;;  %v3197_v29 = vadd.f32 %v2698_v51, %v1503_v37  ;;  %v2701_v35 = vpop.f32.mrf.mxu0  ;;  %v1514_v63 = vadd.f32 %v5641_v27, %v6522_v59 }
 0x164   : > { %v1505_v38 = vpop.f32.mrf.mxu1  ;;  %v3334_v55 = vadd.f32 %v6881_v34, %v3199_v53  ;;  %v6047_v53 = vld [vmem:[%s6162_s26 + $0x1d8] sm:$0xff]  }
 0x165   : > { %5244 = vst [vmem:[%s6902_s6 + $0x8] sm:$0xff] %v4932_v43   ;;  %v4927_v36 = vpack.c.bf16 %v3457_v39, %v3456_v33  ;;  %v1506_v40 = vadd.f32 %v1505_v38, %v6528_v3  ;;  %v5774_v23 = vpop.f32.mrf.mxu0  ;;  %5869 = vmatmul.mubr.msk.bf16.gmra.mxu0 %vm686_vm1, %v6045_v14  ;;  %v3200_v12 = vadd.f32 %v5771_v28, %v1514_v63  ;;  %v6048_v43 = vld [vmem:[%s6162_s26 + $0x1e0] sm:$0xff]  }
 0x166   : > { %v5644_v31 = vpop.f32.mrf.mxu1  ;;  %5739 = vmatmul.mubr.msk.bf16.gmra.mxu1 %vm686_vm1, %v6321_v45  ;;  %5872 = vmatprep.mubr.msk.bf16.mxu0 %vm686_vm1, %v6046_v30  ;;  %v3332_v59 = vadd.f32 %v6881_v34, %v3197_v29  ;;  %v3462_v27 = vmax.f32 %v3334_v55, 0.0 }
 0x167   : > { %4928 = vst [vmem:[%s6902_s6] sm:$0xff] %v4927_v36   ;;  %v3198_v51 = vadd.f32 %v2701_v35, %v1506_v40  ;;  %v1527_v3 = vadd.f32 %v5644_v31, %v6532_v7  ;;  %v2714_v15 = vpop.f32.mrf.mxu0  ;;  %5742 = vmatprep.mubr.msk.bf16.mxu1 %vm686_vm1, %v6327_v47  ;;  %v3335_v8 = vadd.f32 %v6881_v34, %v3200_v12  ;;  %v6069_v31 = vld [vmem:[%s6162_s26 + $0x1b8] sm:$0xff]  }
 0x168   : > { %v1518_v41 = vpop.f32.mrf.mxu1  ;;  %v3460_v7 = vmax.f32 %v3332_v59, 0.0 }
 0x169   : > { %v3333_v37 = vadd.f32 %v6881_v34, %v3198_v51  ;;  %v3203_v28 = vadd.f32 %v5774_v23, %v1527_v3  ;;  %v1519_v45 = vadd.f32 %v1518_v41, %v6540_v42  ;;  %v5775_v14 = vpop.f32.mrf.mxu0  ;;  %v3463_v30 = vmax.f32 %v3335_v8, 0.0  ;;  %v6070_v3 = vld [vmem:[%s6162_s26 + $0x1c0] sm:$0xff]  }
 0x16a   : > { %v5645_v33 = vpop.f32.mrf.mxu1 }
 0x16b   : > { %v3461_v39 = vmax.f32 %v3333_v37, 0.0  ;;  %v1530_v47 = vadd.f32 %v5645_v33, %v6546_v11  ;;  %v2717_v29 = vpop.f32.mrf.mxu0  ;;  %v4942_v35 = vpack.c.bf16 %v3463_v30, %v3462_v27  ;;  %v3201_v63 = vadd.f32 %v2714_v15, %v1519_v45 }
 0x16c   : > { %v1521_v38 = vpop.f32.mrf.mxu1  ;;  %v3338_v42 = vadd.f32 %v6881_v34, %v3203_v28 }
 0x16d   : > { %v4937_v23 = vpack.c.bf16 %v3461_v39, %v3460_v7  ;;  %v3204_v36 = vadd.f32 %v5775_v14, %v1530_v47  ;;  %v5778_v40 = vpop.f32.mrf.mxu0  ;;  %5873 = vmatmul.mubr.msk.bf16.gmra.mxu0 %vm686_vm1, %v6047_v53  ;;  %5246 = vst [vmem:[%s6902_s6 + $0x18] sm:$0xff] %v4942_v35   ;;  %v1522_v55 = vadd.f32 %v1521_v38, %v6552_v19  ;;  %v6049_v53 = vld [vmem:[%s6162_s26 + $0x1e8] sm:$0xff]  }
 0x16e   : > { %v5648_v12 = vpop.f32.mrf.mxu1  ;;  %5743 = vmatmul.mubr.msk.bf16.gmra.mxu1 %vm686_vm1, %v6069_v31  ;;  %5876 = vmatprep.mubr.msk.bf16.mxu0 %vm686_vm1, %v6048_v43  ;;  %v3336_v15 = vadd.f32 %v6881_v34, %v3201_v63  ;;  %v3466_v41 = vmax.f32 %v3338_v42, 0.0 }
 0x16f   : > { %5245 = vst [vmem:[%s6902_s6 + $0x10] sm:$0xff] %v4937_v23   ;;  %v3339_v11 = vadd.f32 %v6881_v34, %v3204_v36  ;;  %v1543_v59 = vadd.f32 %v5648_v12, %v6556_v21  ;;  %v2730_v51 = vpop.f32.mrf.mxu0  ;;  %5746 = vmatprep.mubr.msk.bf16.mxu1 %vm686_vm1, %v6070_v3  ;;  %v3202_v19 = vadd.f32 %v2717_v29, %v1522_v55  ;;  %v6050_v21 = vld [vmem:[%s6162_s26 + $0x1f0] sm:$0xff]  }
 0x170   : > { %v1534_v8 = vpop.f32.mrf.mxu1  ;;  %v3464_v47 = vmax.f32 %v3336_v15, 0.0 }
 0x171   : > { %v3467_v37 = vmax.f32 %v3339_v11, 0.0  ;;  %v3207_v28 = vadd.f32 %v5778_v40, %v1543_v59  ;;  %v1535_v45 = vadd.f32 %v1534_v8, %v6564_v46  ;;  %v5779_v14 = vpop.f32.mrf.mxu0  ;;  %v3337_v27 = vadd.f32 %v6881_v34, %v3202_v19  ;;  %v6071_v40 = vld [vmem:[%s6162_s26 + $0x1c8] sm:$0xff]   ;;  %v6072_v11 = vld [vmem:[%s6162_s26 + $0x1d0] sm:$0xff]  }
 0x172   : > { %v5649_v30 = vpop.f32.mrf.mxu1 }
 0x173   : > { %v4952_v33 = vpack.c.bf16 %v3467_v37, %v3466_v41  ;;  %v3205_v43 = vadd.f32 %v2730_v51, %v1535_v45  ;;  %v1546_v7 = vadd.f32 %v5649_v30, %v6570_v6  ;;  %v2733_v39 = vpop.f32.mrf.mxu0  ;;  %v3465_v29 = vmax.f32 %v3337_v27, 0.0  ;;  %v6051_v41 = vld [vmem:[%s6162_s26 + $0x1f8] sm:$0xff]   ;;  %v6052_v45 = vld [vmem:[%s6162_s26 + $0x200] sm:$0xff]  }
 0x174   : > { %v1537_v35 = vpop.f32.mrf.mxu1  ;;  %v3342_v63 = vadd.f32 %v6881_v34, %v3207_v28 }
 0x175   : > { %5248 = vst [vmem:[%s6902_s6 + $0x28] sm:$0xff] %v4952_v33   ;;  %v3208_v46 = vadd.f32 %v5779_v14, %v1546_v7  ;;  %v1538_v38 = vadd.f32 %v1537_v35, %v6576_v16  ;;  %v5782_v23 = vpop.f32.mrf.mxu0  ;;  %5877 = vmatmul.mubr.msk.bf16.gmra.mxu0 %vm686_vm1, %v6049_v53  ;;  %v4947_v42 = vpack.c.bf16 %v3465_v29, %v3464_v47  ;;  %v6073_v35 = vld [vmem:[%s6162_s26 + $0x1d8] sm:$0xff]  }
 0x176   : > { %v5652_v36 = vpop.f32.mrf.mxu1  ;;  %5747 = vmatmul.mubr.msk.bf16.gmra.mxu1 %vm686_vm1, %v6071_v40  ;;  %5880 = vmatprep.mubr.msk.bf16.mxu0 %vm686_vm1, %v6050_v21  ;;  %v3340_v6 = vadd.f32 %v6881_v34, %v3205_v43  ;;  %v3470_v51 = vmax.f32 %v3342_v63, 0.0 }
 0x177   : > { %v3343_v55 = vadd.f32 %v6881_v34, %v3208_v46  ;;  %v3206_v12 = vadd.f32 %v2733_v39, %v1538_v38  ;;  %v1559_v31 = vadd.f32 %v5652_v36, %v6580_v18  ;;  %v2746_v16 = vpop.f32.mrf.mxu0  ;;  %5750 = vmatprep.mubr.msk.bf16.mxu1 %vm686_vm1, %v6072_v11  ;;  %5247 = vst [vmem:[%s6902_s6 + $0x20] sm:$0xff] %v4947_v42   ;;  %v6074_v38 = vld [vmem:[%s6162_s26 + $0x1e0] sm:$0xff]  }
 0x178   : > { %v1550_v59 = vpop.f32.mrf.mxu1  ;;  %v3468_v18 = vmax.f32 %v3340_v6, 0.0 }
 0x179   : > { %v3471_v3 = vmax.f32 %v3343_v55, 0.0  ;;  %v3341_v15 = vadd.f32 %v6881_v34, %v3206_v12  ;;  %v1551_v19 = vadd.f32 %v1550_v59, %v6588_v50  ;;  %v5783_v8 = vpop.f32.mrf.mxu0  ;;  %v3211_v37 = vadd.f32 %v5782_v23, %v1559_v31  ;;  %v6053_v12 = vld [vmem:[%s6162_s26 + $0x208] sm:$0xff]   ;;  %v6054_v59 = vld [vmem:[%s6162_s26 + $0x210] sm:$0xff]  }
 0x17a   : > { %v5653_v28 = vpop.f32.mrf.mxu1 }
 0x17b   : > { %v4962_v14 = vpack.c.bf16 %v3471_v3, %v3470_v51  ;;  %v3469_v53 = vmax.f32 %v3341_v15, 0.0  ;;  %v3209_v27 = vadd.f32 %v2746_v16, %v1551_v19  ;;  %v2749_v30 = vpop.f32.mrf.mxu0  ;;  %v1562_v21 = vadd.f32 %v5653_v28, %v6594_v24 }
 0x17c   : > { %v1553_v33 = vpop.f32.mrf.mxu1  ;;  %v3346_v39 = vadd.f32 %v6881_v34, %v3211_v37 }
 0x17d   : > { %5250 = vst [vmem:[%s6902_s6 + $0x38] sm:$0xff] %v4962_v14   ;;  %v4957_v43 = vpack.c.bf16 %v3469_v53, %v3468_v18  ;;  %v1554_v50 = vadd.f32 %v1553_v33, %v6600_v49  ;;  %v5786_v7 = vpop.f32.mrf.mxu0  ;;  %5881 = vmatmul.mubr.msk.bf16.gmra.mxu0 %vm686_vm1, %v6051_v41  ;;  %v3212_v47 = vadd.f32 %v5783_v8, %v1562_v21  ;;  %v6075_v53 = vld [vmem:[%s6162_s26 + $0x1e8] sm:$0xff]   ;;  %v6076_v21 = vld [vmem:[%s6162_s26 + $0x1f0] sm:$0xff]  }
 0x17e   : > { %v5656_v29 = vpop.f32.mrf.mxu1  ;;  %5751 = vmatmul.mubr.msk.bf16.gmra.mxu1 %vm686_vm1, %v6073_v35  ;;  %5884 = vmatprep.mubr.msk.bf16.mxu0 %vm686_vm1, %v6052_v45  ;;  %v3344_v24 = vadd.f32 %v6881_v34, %v3209_v27  ;;  %v3474_v31 = vmax.f32 %v3346_v39, 0.0  ;;  %v6055_v35 = vld [vmem:[%s6162_s26 + $0x218] sm:$0xff]  }
 0x17f   : > { %5249 = vst [vmem:[%s6902_s6 + $0x30] sm:$0xff] %v4957_v43   ;;  %v3210_v63 = vadd.f32 %v2749_v30, %v1554_v50  ;;  %v1575_v49 = vadd.f32 %v5656_v29, %v6604_v61  ;;  %v2762_v46 = vpop.f32.mrf.mxu0  ;;  %5754 = vmatprep.mubr.msk.bf16.mxu1 %vm686_vm1, %v6074_v38  ;;  %v3347_v23 = vadd.f32 %v6881_v34, %v3212_v47 }
 0x180   : > { %v1566_v42 = vpop.f32.mrf.mxu1  ;;  %v3472_v61 = vmax.f32 %v3344_v24, 0.0 }
 0x181   : > { %v3345_v36 = vadd.f32 %v6881_v34, %v3210_v63  ;;  %v3215_v40 = vadd.f32 %v5786_v7, %v1575_v49  ;;  %v1567_v6 = vadd.f32 %v1566_v42, %v6612_v54  ;;  %v5787_v55 = vpop.f32.mrf.mxu0  ;;  %v3475_v16 = vmax.f32 %v3347_v23, 0.0 }
 0x182   : > { %v5657_v11 = vpop.f32.mrf.mxu1 }
 0x183   : > { %v3473_v51 = vmax.f32 %v3345_v36, 0.0  ;;  %v1578_v3 = vadd.f32 %v5657_v11, %v6618_v17  ;;  %v2765_v15 = vpop.f32.mrf.mxu0  ;;  %v4972_v19 = vpack.c.bf16 %v3475_v16, %v3474_v31  ;;  %v3213_v8 = vadd.f32 %v2762_v46, %v1567_v6  ;;  %v6077_v16 = vld [vmem:[%s6162_s26 + $0x1f8] sm:$0xff]  }
 0x184   : > { %v1569_v41 = vpop.f32.mrf.mxu1  ;;  %v3350_v54 = vadd.f32 %v6881_v34, %v3215_v40 }
 0x185   : > { %v4967_v37 = vpack.c.bf16 %v3473_v51, %v3472_v61  ;;  %v3216_v28 = vadd.f32 %v5787_v55, %v1578_v3  ;;  %v5790_v45 = vpop.f32.mrf.mxu0  ;;  %5885 = vmatmul.mubr.msk.bf16.gmra.mxu0 %vm686_vm1, %v6053_v12  ;;  %5252 = vst [vmem:[%s6902_s6 + $0x48] sm:$0xff] %v4972_v19   ;;  %v1570_v18 = vadd.f32 %v1569_v41, %v6624_v1 }
 0x186   : > { %v5660_v14 = vpop.f32.mrf.mxu1  ;;  %5755 = vmatmul.mubr.msk.bf16.gmra.mxu1 %vm686_vm1, %v6075_v53  ;;  %5888 = vmatprep.mubr.msk.bf16.mxu0 %vm686_vm1, %v6054_v59  ;;  %v3348_v33 = vadd.f32 %v6881_v34, %v3213_v8  ;;  %v3478_v50 = vmax.f32 %v3350_v54, 0.0 }
 0x187   : > { %5251 = vst [vmem:[%s6902_s6 + $0x40] sm:$0xff] %v4967_v37   ;;  %v3351_v17 = vadd.f32 %v6881_v34, %v3216_v28  ;;  %v1591_v27 = vadd.f32 %v5660_v14, %v6628_v32  ;;  %v2778_v30 = vpop.f32.mrf.mxu0  ;;  %5758 = vmatprep.mubr.msk.bf16.mxu1 %vm686_vm1, %v6076_v21  ;;  %v3214_v43 = vadd.f32 %v2765_v15, %v1570_v18 }
 0x188   : > { %v1582_v1 = vpop.f32.mrf.mxu1  ;;  %v3476_v23 = vmax.f32 %v3348_v33, 0.0 }
 0x189   : > { %v3479_v7 = vmax.f32 %v3351_v17, 0.0  ;;  %v3219_v39 = vadd.f32 %v5790_v45, %v1591_v27  ;;  %v1583_v47 = vadd.f32 %v1582_v1, %v6636_v58  ;;  %v5791_v29 = vpop.f32.mrf.mxu0  ;;  %v3349_v24 = vadd.f32 %v6881_v34, %v3214_v43 }
 0x18a   : > { %v5661_v63 = vpop.f32.mrf.mxu1 }
 0x18b   : > { %v4982_v32 = vpack.c.bf16 %v3479_v7, %v3478_v50  ;;  %v3217_v49 = vadd.f32 %v2778_v30, %v1583_v47  ;;  %v1594_v46 = vadd.f32 %v5661_v63, %v6642_v56  ;;  %v2781_v38 = vpop.f32.mrf.mxu0  ;;  %v3477_v42 = vmax.f32 %v3349_v24, 0.0 }
 0x18c   : > { %v1585_v36 = vpop.f32.mrf.mxu1  ;;  %v3354_v40 = vadd.f32 %v6881_v34, %v3219_v39 }
 0x18d   : > { %5254 = vst [vmem:[%s6902_s6 + $0x58] sm:$0xff] %v4982_v32   ;;  %v3220_v6 = vadd.f32 %v5791_v29, %v1594_v46  ;;  %v1586_v58 = vadd.f32 %v1585_v36, %v6648_v26  ;;  %v5794_v55 = vpop.f32.mrf.mxu0  ;;  %5889 = vmatmul.mubr.msk.bf16.gmra.mxu0 %vm686_vm1, %v6055_v35  ;;  %v4977_v12 = vpack.c.bf16 %v3477_v42, %v3476_v23 }
 0x18e   : > { %v5664_v31 = vpop.f32.mrf.mxu1  ;;  %5759 = vmatmul.mubr.msk.bf16.gmra.mxu1 %vm686_vm1, %v6077_v16  ;;  %v3352_v56 = vadd.f32 %v6881_v34, %v3217_v49  ;;  %v3482_v26 = vmax.f32 %v3354_v40, 0.0 }
 0x18f   : > { %v3355_v11 = vadd.f32 %v6881_v34, %v3220_v6  ;;  %v3218_v59 = vadd.f32 %v2781_v38, %v1586_v58  ;;  %v1607_v61 = vadd.f32 %v5664_v31, %v6652_v25  ;;  %v2794_v51 = vpop.f32.mrf.mxu0  ;;  %5253 = vst [vmem:[%s6902_s6 + $0x50] sm:$0xff] %v4977_v12  }
 0x190   : > { %v1598_v3 = vpop.f32.mrf.mxu1  ;;  %v3480_v28 = vmax.f32 %v3352_v56, 0.0 }
 0x191   : > { %v3483_v15 = vmax.f32 %v3355_v11, 0.0  ;;  %v3353_v19 = vadd.f32 %v6881_v34, %v3218_v59  ;;  %v1599_v8 = vadd.f32 %v1598_v3, %v6660_v62  ;;  %v5795_v41 = vpop.f32.mrf.mxu0  ;;  %v3223_v37 = vadd.f32 %v5794_v55, %v1607_v61 }
 0x192   : > { %v5665_v54 = vpop.f32.mrf.mxu1 }
 0x193   : > { %v4992_v45 = vpack.c.bf16 %v3483_v15, %v3482_v26  ;;  %v3481_v18 = vmax.f32 %v3353_v19, 0.0  ;;  %v3221_v14 = vadd.f32 %v2794_v51, %v1599_v8  ;;  %v2797_v53 = vpop.f32.mrf.mxu0  ;;  %v1610_v25 = vadd.f32 %v5665_v54, %v6666_v60 }
 0x194   : > { %v1601_v17 = vpop.f32.mrf.mxu1  ;;  %v3358_v33 = vadd.f32 %v6881_v34, %v3223_v37 }
 0x195   : > { %5256 = vst [vmem:[%s6902_s6 + $0x68] sm:$0xff] %v4992_v45   ;;  %v4987_v27 = vpack.c.bf16 %v3481_v18, %v3480_v28  ;;  %v1602_v30 = vadd.f32 %v1601_v17, %v6672_v20  ;;  %v5798_v21 = vpop.f32.mrf.mxu0  ;;  %v3224_v62 = vadd.f32 %v5795_v41, %v1610_v25  ;;  %v3356_v1 = vadd.f32 %v6881_v34, %v3221_v14 }
 0x196   : > { %v5668_v43 = vpop.f32.mrf.mxu1  ;;  %v3486_v63 = vmax.f32 %v3358_v33, 0.0 }
 0x197   : > { %5255 = vst [vmem:[%s6902_s6 + $0x60] sm:$0xff] %v4987_v27   ;;  %v3222_v50 = vadd.f32 %v2797_v53, %v1602_v30  ;;  %v1623_v7 = vadd.f32 %v5668_v43, %v6676_v52  ;;  %v2810_v39 = vpop.f32.mrf.mxu0  ;;  %v3359_v47 = vadd.f32 %v6881_v34, %v3224_v62  ;;  %v3484_v46 = vmax.f32 %v3356_v1, 0.0 }
 0x198   : > { %v1614_v60 = vpop.f32.mrf.mxu1 }
 0x199   : > { %v3357_v29 = vadd.f32 %v6881_v34, %v3222_v50  ;;  %v3227_v35 = vadd.f32 %v5798_v21, %v1623_v7  ;;  %v1615_v20 = vadd.f32 %v1614_v60, %v6684_v2  ;;  %v5799_v24 = vpop.f32.mrf.mxu0  ;;  %v3487_v32 = vmax.f32 %v3359_v47, 0.0 }
 0x19a   : > { %v5669_v49 = vpop.f32.mrf.mxu1 }
 0x19b   : > { %v3485_v38 = vmax.f32 %v3357_v29, 0.0  ;;  %v1626_v23 = vadd.f32 %v5669_v49, %v6690_v0  ;;  %v2813_v52 = vpop.f32.mrf.mxu0  ;;  %v5002_v42 = vpack.c.bf16 %v3487_v32, %v3486_v63  ;;  %v3225_v36 = vadd.f32 %v2810_v39, %v1615_v20 }
 0x19c   : > { %v1617_v40 = vpop.f32.mrf.mxu1  ;;  %v3362_v58 = vadd.f32 %v6881_v34, %v3227_v35 }
 0x19d   : > { %v4997_v6 = vpack.c.bf16 %v3485_v38, %v3484_v46  ;;  %v3228_v55 = vadd.f32 %v5799_v24, %v1626_v23  ;;  %v5802_v12 = vpop.f32.mrf.mxu0  ;;  %5258 = vst [vmem:[%s6902_s6 + $0x78] sm:$0xff] %v5002_v42   ;;  %v1618_v2 = vadd.f32 %v1617_v40, %v6696_v4  ;;  %v3360_v0 = vadd.f32 %v6881_v34, %v3225_v36  ;;  %v7359_v40 = vld [vmem:[#allocation46_spill] sm:$0xff] }
 0x19e   : > { %v5672_v31 = vpop.f32.mrf.mxu1  ;;  %v3490_v51 = vmax.f32 %v3362_v58, 0.0 }
 0x19f   : > { %5257 = vst [vmem:[%s6902_s6 + $0x70] sm:$0xff] %v4997_v6   ;;  %v3363_v16 = vadd.f32 %v6881_v34, %v3228_v55  ;;  %v1639_v56 = vadd.f32 %v5672_v31, %v6700_v22  ;;  %v2826_v11 = vpop.f32.mrf.mxu0  ;;  %v3226_v59 = vadd.f32 %v2813_v52, %v1618_v2  ;;  %v3488_v28 = vmax.f32 %v3360_v0, 0.0  ;;  %v7360_v31 = vld [vmem:[#allocation48_spill] sm:$0xff] }
 0x1a0   : > { %v1630_v61 = vpop.f32.mrf.mxu1 }
 0x1a1   : > { %v3491_v3 = vmax.f32 %v3363_v16, 0.0  ;;  %v3231_v26 = vadd.f32 %v5802_v12, %v1639_v56  ;;  %v1631_v15 = vadd.f32 %v1630_v61, %v6708_v10  ;;  %v5803_v19 = vpop.f32.mrf.mxu0  ;;  %v3361_v4 = vadd.f32 %v6881_v34, %v3226_v59 }
 0x1a2   : > { %v5673_v8 = vpop.f32.mrf.mxu1 }
 0x1a3   : > { %v5012_v41 = vpack.c.bf16 %v3491_v3, %v3490_v51  ;;  %v3229_v37 = vadd.f32 %v2826_v11, %v1631_v15  ;;  %v1642_v54 = vadd.f32 %v5673_v8, %v6714_v5  ;;  %v2829_v22 = vpop.f32.mrf.mxu0  ;;  %v3489_v45 = vmax.f32 %v3361_v4, 0.0  ;;  %v7361_v51 = vld [vmem:[#allocation50_spill] sm:$0xff] }
 0x1a4   : > { %v1633_v18 = vpop.f32.mrf.mxu1  ;;  %v3366_v14 = vadd.f32 %v6881_v34, %v3231_v26 }
 0x1a5   : > { %5260 = vst [vmem:[%s6902_s6 + $0x88] sm:$0xff] %v5012_v41   ;;  %v3232_v53 = vadd.f32 %v5803_v19, %v1642_v54  ;;  %v1634_v25 = vadd.f32 %v1633_v18, %v6720_v9  ;;  %v5806_v10 = vpop.f32.mrf.mxu0  ;;  %v5007_v17 = vpack.c.bf16 %v3489_v45, %v3488_v28  ;;  %v3364_v30 = vadd.f32 %v6881_v34, %v3229_v37 }
 0x1a6   : > { %v5676_v27 = vpop.f32.mrf.mxu1  ;;  %v3494_v1 = vmax.f32 %v3366_v14, 0.0  ;;  %v7363_v14 = vld [vmem:[#allocation54_spill] sm:$0xff] }
 0x1a7   : > { %v3367_v21 = vadd.f32 %v6881_v34, %v3232_v53  ;;  %v3230_v33 = vadd.f32 %v2829_v22, %v1634_v25  ;;  %v1655_v5 = vadd.f32 %v5676_v27, %v6724_v48  ;;  %v2842_v62 = vpop.f32.mrf.mxu0  ;;  %5259 = vst [vmem:[%s6902_s6 + $0x80] sm:$0xff] %v5007_v17   ;;  %v3492_v29 = vmax.f32 %v3364_v30, 0.0  ;;  %v7362_v22 = vld [vmem:[#allocation52_spill] sm:$0xff] }
 0x1a8   : > { %v1646_v43 = vpop.f32.mrf.mxu1 }
 0x1a9   : > { %v3495_v50 = vmax.f32 %v3367_v21, 0.0  ;;  %v3365_v7 = vadd.f32 %v6881_v34, %v3230_v33  ;;  %v1647_v9 = vadd.f32 %v1646_v43, %v6732_v44  ;;  %v5807_v39 = vpop.f32.mrf.mxu0  ;;  %v3235_v47 = vadd.f32 %v5806_v10, %v1655_v5  ;;  %v7364_v5 = vld [vmem:[#allocation56_spill] sm:$0xff] }
 0x1aa   : > { %v5677_v60 = vpop.f32.mrf.mxu1 }
 0x1ab   : > { %v5022_v35 = vpack.c.bf16 %v3495_v50, %v3494_v1  ;;  %v3493_v20 = vmax.f32 %v3365_v7, 0.0  ;;  %v3233_v24 = vadd.f32 %v2842_v62, %v1647_v9  ;;  %v2845_v63 = vpop.f32.mrf.mxu0  ;;  %v1658_v48 = vadd.f32 %v5677_v60, %v6738_v13 }
 0x1ac   : > { %v1649_v32 = vpop.f32.mrf.mxu1  ;;  %v3370_v23 = vadd.f32 %v6881_v34, %v3235_v47 }
 0x1ad   : > { %5262 = vst [vmem:[%s6902_s6 + $0x98] sm:$0xff] %v5022_v35   ;;  %v5017_v49 = vpack.c.bf16 %v3493_v20, %v3492_v29  ;;  %v1650_v46 = vadd.f32 %v1649_v32, %v6744_v57  ;;  %v5810_v38 = vpop.f32.mrf.mxu0  ;;  %v3236_v44 = vadd.f32 %v5807_v39, %v1658_v48  ;;  %v3368_v42 = vadd.f32 %v6881_v34, %v3233_v24  ;;  %v7365_v39 = vld [vmem:[#allocation58_spill] sm:$0xff]  ;;  %v7366_v48 = vld [vmem:[#allocation60_spill] sm:$0xff] }
 0x1ae   : > { %v5680_v52 = vpop.f32.mrf.mxu1  ;;  %v3498_v56 = vmax.f32 %v3370_v23, 0.0 }
 0x1af   : > { %5261 = vst [vmem:[%s6902_s6 + $0x90] sm:$0xff] %v5017_v49   ;;  %v3234_v36 = vadd.f32 %v2845_v63, %v1650_v46  ;;  %v1671_v6 = vadd.f32 %v5680_v52, %v7359_v40  ;;  %v2858_v58 = vpop.f32.mrf.mxu0  ;;  %v3371_v55 = vadd.f32 %v6881_v34, %v3236_v44  ;;  %v3496_v59 = vmax.f32 %v3368_v42, 0.0  ;;  %v7367_v42 = vld [vmem:[#allocation62_spill] sm:$0xff] }
 0x1b0   : > { %v1662_v13 = vpop.f32.mrf.mxu1 }
 0x1b1   : > { %v3369_v12 = vadd.f32 %v6881_v34, %v3234_v36  ;;  %v3239_v2 = vadd.f32 %v5810_v38, %v1671_v6  ;;  %v1663_v57 = vadd.f32 %v1662_v13, %v7360_v31  ;;  %v5811_v16 = vpop.f32.mrf.mxu0  ;;  %v3499_v11 = vmax.f32 %v3371_v55, 0.0 }
 0x1b2   : > { %v5681_v0 = vpop.f32.mrf.mxu1 }
 0x1b3   : > { %v3497_v61 = vmax.f32 %v3369_v12, 0.0  ;;  %v1674_v3 = vadd.f32 %v5681_v0, %v7361_v51  ;;  %v2861_v26 = vpop.f32.mrf.mxu0  ;;  %v5032_v15 = vpack.c.bf16 %v3499_v11, %v3498_v56  ;;  %v3237_v19 = vadd.f32 %v2858_v58, %v1663_v57  ;;  %v7368_v12 = vld [vmem:[#allocation64_spill] sm:$0xff]  ;;  %v7369_v51 = vld [vmem:[#allocation66_spill] sm:$0xff] }
 0x1b4   : > { %v1665_v4 = vpop.f32.mrf.mxu1  ;;  %v3374_v41 = vadd.f32 %v6881_v34, %v3239_v2 }
 0x1b5   : > { %v5027_v8 = vpack.c.bf16 %v3497_v61, %v3496_v59  ;;  %v3240_v37 = vadd.f32 %v5811_v16, %v1674_v3  ;;  %v5814_v54 = vpop.f32.mrf.mxu0  ;;  %5264 = vst [vmem:[%s6902_s6 + $0xa8] sm:$0xff] %v5032_v15   ;;  %v1666_v28 = vadd.f32 %v1665_v4, %v7362_v22  ;;  %v3372_v10 = vadd.f32 %v6881_v34, %v3237_v19  ;;  %v7370_v19 = vld [vmem:[#allocation68_spill] sm:$0xff] }
 0x1b6   : > { %v5684_v45 = vpop.f32.mrf.mxu1  ;;  %v3502_v30 = vmax.f32 %v3374_v41, 0.0 }
 0x1b7   : > { %5263 = vst [vmem:[%s6902_s6 + $0xa0] sm:$0xff] %v5027_v8   ;;  %v3375_v18 = vadd.f32 %v6881_v34, %v3240_v37  ;;  %v1687_v53 = vadd.f32 %v5684_v45, %v7363_v14  ;;  %v2874_v25 = vpop.f32.mrf.mxu0  ;;  %v3238_v17 = vadd.f32 %v2861_v26, %v1666_v28  ;;  %v3500_v29 = vmax.f32 %v3372_v10, 0.0  ;;  %v7371_v45 = vld [vmem:[#allocation70_spill] sm:$0xff] }
 0x1b8   : > { %v1678_v27 = vpop.f32.mrf.mxu1 }
 0x1b9   : > { %v3503_v21 = vmax.f32 %v3375_v18, 0.0  ;;  %v3243_v33 = vadd.f32 %v5814_v54, %v1687_v53  ;;  %v1679_v62 = vadd.f32 %v1678_v27, %v7364_v5  ;;  %v5815_v43 = vpop.f32.mrf.mxu0  ;;  %v3373_v1 = vadd.f32 %v6881_v34, %v3238_v17  ;;  %v7372_v27 = vld [vmem:[#allocation72_spill] sm:$0xff] }
 0x1ba   : > { %v5685_v50 = vpop.f32.mrf.mxu1 }
 0x1bb   : > { %v5042_v7 = vpack.c.bf16 %v3503_v21, %v3502_v30  ;;  %v3241_v9 = vadd.f32 %v2874_v25, %v1679_v62  ;;  %v1690_v47 = vadd.f32 %v5685_v50, %v7365_v39  ;;  %v2877_v60 = vpop.f32.mrf.mxu0  ;;  %v3501_v35 = vmax.f32 %v3373_v1, 0.0  ;;  %v7373_v50 = vld [vmem:[#allocation74_spill] sm:$0xff] }
 0x1bc   : > { %v1681_v20 = vpop.f32.mrf.mxu1  ;;  %v3378_v24 = vadd.f32 %v6881_v34, %v3243_v33 }
 0x1bd   : > { %5266 = vst [vmem:[%s6902_s6 + $0xb8] sm:$0xff] %v5042_v7   ;;  %v3244_v63 = vadd.f32 %v5815_v43, %v1690_v47  ;;  %v1682_v32 = vadd.f32 %v1681_v20, %v7366_v48  ;;  %v5818_v49 = vpop.f32.mrf.mxu0  ;;  %v5037_v46 = vpack.c.bf16 %v3501_v35, %v3500_v29  ;;  %v3376_v23 = vadd.f32 %v6881_v34, %v3241_v9 }
 0x1be   : > { %v5688_v38 = vpop.f32.mrf.mxu1  ;;  %v3506_v58 = vmax.f32 %v3378_v24, 0.0 }
 0x1bf   : > { %v3379_v44 = vadd.f32 %v6881_v34, %v3244_v63  ;;  %v3242_v52 = vadd.f32 %v2877_v60, %v1682_v32  ;;  %v1703_v36 = vadd.f32 %v5688_v38, %v7367_v42  ;;  %v2890_v40 = vpop.f32.mrf.mxu0  ;;  %5265 = vst [vmem:[%s6902_s6 + $0xb0] sm:$0xff] %v5037_v46   ;;  %v3504_v56 = vmax.f32 %v3376_v23, 0.0  ;;  %v7374_v63 = vld [vmem:[#allocation76_spill] sm:$0xff]  ;;  %v7375_v46 = vld [vmem:[#allocation78_spill] sm:$0xff] }
 0x1c0   : > { %v1694_v6 = vpop.f32.mrf.mxu1 }
 0x1c1   : > { %v3507_v55 = vmax.f32 %v3379_v44, 0.0  ;;  %v3377_v13 = vadd.f32 %v6881_v34, %v3242_v52  ;;  %v1695_v2 = vadd.f32 %v1694_v6, %v7368_v12  ;;  %v5819_v31 = vpop.f32.mrf.mxu0  ;;  %v3247_v57 = vadd.f32 %v5818_v49, %v1703_v36 }
 0x1c2   : > { %v5689_v16 = vpop.f32.mrf.mxu1 }
 0x1c3   : > { %v5052_v11 = vpack.c.bf16 %v3507_v55, %v3506_v58  ;;  %v3505_v0 = vmax.f32 %v3377_v13, 0.0  ;;  %v3245_v59 = vadd.f32 %v2890_v40, %v1695_v2  ;;  %v2893_v61 = vpop.f32.mrf.mxu0  ;;  %v1706_v3 = vadd.f32 %v5689_v16, %v7369_v51  ;;  %v7376_v58 = vld [vmem:[#allocation80_spill] sm:$0xff]  ;;  %v7377_v16 = vld [vmem:[#allocation82_spill] sm:$0xff] }
 0x1c4   : > { %v1697_v26 = vpop.f32.mrf.mxu1  ;;  %v3382_v41 = vadd.f32 %v6881_v34, %v3247_v57 }
 0x1c5   : > { %5268 = vst [vmem:[%s6902_s6 + $0xc8] sm:$0xff] %v5052_v11   ;;  %v5047_v15 = vpack.c.bf16 %v3505_v0, %v3504_v56  ;;  %v1698_v4 = vadd.f32 %v1697_v26, %v7370_v19  ;;  %v5822_v8 = vpop.f32.mrf.mxu0  ;;  %v3248_v37 = vadd.f32 %v5819_v31, %v1706_v3  ;;  %v3380_v22 = vadd.f32 %v6881_v34, %v3245_v59  ;;  %v7378_v26 = vld [vmem:[#allocation84_spill] sm:$0xff] }
 0x1c6   : > { %v5692_v54 = vpop.f32.mrf.mxu1  ;;  %v3510_v33 = vmax.f32 %v3382_v41, 0.0 }
 0x1c7   : > { %5267 = vst [vmem:[%s6902_s6 + $0xc0] sm:$0xff] %v5047_v15   ;;  %v3246_v28 = vadd.f32 %v2893_v61, %v1698_v4  ;;  %v1719_v18 = vadd.f32 %v5692_v54, %v7371_v45  ;;  %v2906_v14 = vpop.f32.mrf.mxu0  ;;  %v3383_v53 = vadd.f32 %v6881_v34, %v3248_v37  ;;  %v3508_v43 = vmax.f32 %v3380_v22, 0.0  ;;  %v7379_v22 = vld [vmem:[#allocation2_spill] sm:$0xff] }
 0x1c8   : > { %v1710_v25 = vpop.f32.mrf.mxu1 }
 0x1c9   : > { %v3381_v10 = vadd.f32 %v6881_v34, %v3246_v28  ;;  %v3251_v17 = vadd.f32 %v5822_v8, %v1719_v18  ;;  %v1711_v30 = vadd.f32 %v1710_v25, %v7372_v27  ;;  %v5823_v21 = vpop.f32.mrf.mxu0  ;;  %v3511_v5 = vmax.f32 %v3383_v53, 0.0 }
 0x1ca   : > { %v5693_v62 = vpop.f32.mrf.mxu1 }
 0x1cb   : > { %v3509_v1 = vmax.f32 %v3381_v10, 0.0  ;;  %v1722_v7 = vadd.f32 %v5693_v62, %v7373_v50  ;;  %v2909_v9 = vpop.f32.mrf.mxu0  ;;  %v5062_v39 = vpack.c.bf16 %v3511_v5, %v3510_v33  ;;  %v3249_v47 = vadd.f32 %v2906_v14, %v1711_v30  ;;  %v7380_v10 = vld [vmem:[#allocation3_spill] sm:$0xff]  ;;  %v7381_v50 = vld [vmem:[#allocation4_spill] sm:$0xff] }
 0x1cc   : > { %v1713_v60 = vpop.f32.mrf.mxu1  ;;  %v3386_v35 = vadd.f32 %v6881_v34, %v3251_v17 }
 0x1cd   : > { %v5057_v29 = vpack.c.bf16 %v3509_v1, %v3508_v43  ;;  %v3252_v20 = vadd.f32 %v5823_v21, %v1722_v7  ;;  %v5826_v24 = vpop.f32.mrf.mxu0  ;;  %5270 = vst [vmem:[%s6902_s6 + $0xd8] sm:$0xff] %v5062_v39   ;;  %v1714_v48 = vadd.f32 %v1713_v60, %v7374_v63  ;;  %v3384_v44 = vadd.f32 %v6881_v34, %v3249_v47  ;;  %v7382_v47 = vld [vmem:[#allocation5_spill] sm:$0xff] }
 0x1ce   : > { %v5696_v32 = vpop.f32.mrf.mxu1  ;;  %v3514_v36 = vmax.f32 %v3386_v35, 0.0 }
 0x1cf   : > { %5269 = vst [vmem:[%s6902_s6 + $0xd0] sm:$0xff] %v5057_v29   ;;  %v3387_v49 = vadd.f32 %v6881_v34, %v3252_v20  ;;  %v1735_v38 = vadd.f32 %v5696_v32, %v7375_v46  ;;  %v2922_v23 = vpop.f32.mrf.mxu0  ;;  %v3250_v52 = vadd.f32 %v2909_v9, %v1714_v48  ;;  %v3512_v0 = vmax.f32 %v3384_v44, 0.0  ;;  %v7383_v32 = vld [vmem:[#allocation6_spill] sm:$0xff] }
 0x1d0   : > { %v1726_v42 = vpop.f32.mrf.mxu1 }
 0x1d1   : > { %v3515_v40 = vmax.f32 %v3387_v49, 0.0  ;;  %v3255_v6 = vadd.f32 %v5826_v24, %v1735_v38  ;;  %v1727_v55 = vadd.f32 %v1726_v42, %v7376_v58  ;;  %v5827_v13 = vpop.f32.mrf.mxu0  ;;  %v3385_v12 = vadd.f32 %v6881_v34, %v3250_v52  ;;  %v7384_v42 = vld [vmem:[#allocation7_spill] sm:$0xff] }
 0x1d2   : > { %v5697_v2 = vpop.f32.mrf.mxu1 }
 0x1d3   : > { %v5072_v31 = vpack.c.bf16 %v3515_v40, %v3514_v36  ;;  %v3253_v57 = vadd.f32 %v2922_v23, %v1727_v55  ;;  %v1738_v56 = vadd.f32 %v5697_v2, %v7377_v16  ;;  %v2925_v11 = vpop.f32.mrf.mxu0  ;;  %v3513_v59 = vmax.f32 %v3385_v12, 0.0  ;;  %v7385_v2 = vld [vmem:[#allocation8_spill] sm:$0xff] }
 0x1d4   : > { %v1729_v61 = vpop.f32.mrf.mxu1  ;;  %v3390_v51 = vadd.f32 %v6881_v34, %v3255_v6 }
 0x1d5   : > { %5272 = vst [vmem:[%s6902_s6 + $0xe8] sm:$0xff] %v5072_v31   ;;  %v3256_v3 = vadd.f32 %v5827_v13, %v1738_v56  ;;  %v1730_v15 = vadd.f32 %v1729_v61, %v7378_v26  ;;  %v5830_v19 = vpop.f32.mrf.mxu0  ;;  %v5067_v4 = vpack.c.bf16 %v3513_v59, %v3512_v0  ;;  %v3388_v41 = vadd.f32 %v6881_v34, %v3253_v57 }
 0x1d6   : > { %v5700_v8 = vpop.f32.mrf.mxu1  ;;  %v3518_v14 = vmax.f32 %v3390_v51, 0.0 }
 0x1d7   : > { %v3391_v37 = vadd.f32 %v6881_v34, %v3256_v3  ;;  %v3254_v54 = vadd.f32 %v2925_v11, %v1730_v15  ;;  %v1751_v28 = vadd.f32 %v5700_v8, %v7379_v22  ;;  %v2938_v45 = vpop.f32.mrf.mxu0  ;;  %5271 = vst [vmem:[%s6902_s6 + $0xe0] sm:$0xff] %v5067_v4   ;;  %v3516_v33 = vmax.f32 %v3388_v41, 0.0  ;;  %v7386_v3 = vld [vmem:[#allocation9_spill] sm:$0xff]  ;;  %v7387_v4 = vld [vmem:[#allocation10_spill] sm:$0xff] }
 0x1d8   : > { %v1742_v18 = vpop.f32.mrf.mxu1 }
 0x1d9   : > { %v3519_v53 = vmax.f32 %v3391_v37, 0.0  ;;  %v3389_v25 = vadd.f32 %v6881_v34, %v3254_v54  ;;  %v1743_v17 = vadd.f32 %v1742_v18, %v7380_v10  ;;  %v5831_v27 = vpop.f32.mrf.mxu0  ;;  %v3259_v30 = vadd.f32 %v5830_v19, %v1751_v28 }
 0x1da   : > { %v5701_v21 = vpop.f32.mrf.mxu1 }
 0x1db   : > { %v5082_v5 = vpack.c.bf16 %v3519_v53, %v3518_v14  ;;  %v3517_v62 = vmax.f32 %v3389_v25, 0.0  ;;  %v3257_v43 = vadd.f32 %v2938_v45, %v1743_v17  ;;  %v2941_v1 = vpop.f32.mrf.mxu0  ;;  %v1754_v7 = vadd.f32 %v5701_v21, %v7381_v50  ;;  %v7388_v14 = vld [vmem:[#allocation11_spill] sm:$0xff]  ;;  %v7389_v21 = vld [vmem:[#allocation12_spill] sm:$0xff] }
 0x1dc   : > { %v1745_v9 = vpop.f32.mrf.mxu1  ;;  %v3394_v35 = vadd.f32 %v6881_v34, %v3259_v30 }
 0x1dd   : > { %5274 = vst [vmem:[%s6902_s6 + $0xf8] sm:$0xff] %v5082_v5   ;;  %v5077_v39 = vpack.c.bf16 %v3517_v62, %v3516_v33  ;;  %v1746_v60 = vadd.f32 %v1745_v9, %v7382_v47  ;;  %v5834_v29 = vpop.f32.mrf.mxu0  ;;  %v3260_v20 = vadd.f32 %v5831_v27, %v1754_v7  ;;  %v3392_v63 = vadd.f32 %v6881_v34, %v3257_v43  ;;  %v7390_v9 = vld [vmem:[#allocation13_spill] sm:$0xff] }
 0x1de   : > { %v5704_v24 = vpop.f32.mrf.mxu1  ;;  %v3522_v6 = vmax.f32 %v3394_v35, 0.0 }
 0x1df   : > { %5273 = vst [vmem:[%s6902_s6 + $0xf0] sm:$0xff] %v5077_v39   ;;  %v3258_v48 = vadd.f32 %v2941_v1, %v1746_v60  ;;  %v1767_v49 = vadd.f32 %v5704_v24, %v7383_v32  ;;  %v2954_v46 = vpop.f32.mrf.mxu0  ;;  %v3395_v38 = vadd.f32 %v6881_v34, %v3260_v20  ;;  %v3520_v13 = vmax.f32 %v3392_v63, 0.0  ;;  %v7391_v63 = vld [vmem:[#allocation14_spill] sm:$0xff] }
 0x1e0   : > { %v1758_v23 = vpop.f32.mrf.mxu1 }
 0x1e1   : > { %v3393_v44 = vadd.f32 %v6881_v34, %v3258_v48  ;;  %v3263_v52 = vadd.f32 %v5834_v29, %v1767_v49  ;;  %v1759_v36 = vadd.f32 %v1758_v23, %v7384_v42  ;;  %v5835_v40 = vpop.f32.mrf.mxu0  ;;  %v3523_v58 = vmax.f32 %v3395_v38, 0.0  ;;  %v7111_v34 = vld [vmem:[%s7273_s2] ss:$0 sm:$0xff] }
 0x1e2   : > { %v5705_v55 = vpop.f32.mrf.mxu1 }
 0x1e3   : > { %v3521_v12 = vmax.f32 %v3393_v44, 0.0  ;;  %v1770_v31 = vadd.f32 %v5705_v55, %v7385_v2  ;;  %v2957_v57 = vpop.f32.mrf.mxu0  ;;  %v5092_v16 = vpack.c.bf16 %v3523_v58, %v3522_v6  ;;  %v3261_v56 = vadd.f32 %v2954_v46, %v1759_v36  ;;  %v7392_v44 = vld [vmem:[#allocation15_spill] sm:$0xff]  ;;  %v7393_v2 = vld [vmem:[#allocation16_spill] sm:$0xff] }
 0x1e4   : > { %v1761_v11 = vpop.f32.mrf.mxu1  ;;  %v3398_v59 = vadd.f32 %v7111_v34, %v3263_v52 }
 0x1e5   : > { %v5087_v0 = vpack.c.bf16 %v3521_v12, %v3520_v13  ;;  %v3264_v61 = vadd.f32 %v5835_v40, %v1770_v31  ;;  %v5838_v51 = vpop.f32.mrf.mxu0  ;;  %5276 = vst [vmem:[%s6902_s6 + $0x108] sm:$0xff] %v5092_v16   ;;  %v1762_v26 = vadd.f32 %v1761_v11, %v7386_v3  ;;  %v3396_v37 = vadd.f32 %v7111_v34, %v3261_v56  ;;  %v7394_v56 = vld [vmem:[#allocation17_spill] sm:$0xff] }
 0x1e6   : > { %v5708_v15 = vpop.f32.mrf.mxu1  ;;  %v3526_v28 = vmax.f32 %v3398_v59, 0.0 }
 0x1e7   : > { %5275 = vst [vmem:[%s6902_s6 + $0x100] sm:$0xff] %v5087_v0   ;;  %v3399_v19 = vadd.f32 %v7111_v34, %v3264_v61  ;;  %v1783_v8 = vadd.f32 %v5708_v15, %v7387_v4  ;;  %v2970_v41 = vpop.f32.mrf.mxu0  ;;  %v3262_v54 = vadd.f32 %v2957_v57, %v1762_v26  ;;  %v3524_v62 = vmax.f32 %v3396_v37, 0.0  ;;  %v7395_v15 = vld [vmem:[#allocation18_spill] sm:$0xff] }
 0x1e8   : > { %v1774_v22 = vpop.f32.mrf.mxu1 }
 0x1e9   : > { %v3527_v45 = vmax.f32 %v3399_v19, 0.0  ;;  %v3267_v18 = vadd.f32 %v5838_v51, %v1783_v8  ;;  %v1775_v53 = vadd.f32 %v1774_v22, %v7388_v14  ;;  %v5839_v25 = vpop.f32.mrf.mxu0  ;;  %v3397_v10 = vadd.f32 %v7111_v34, %v3262_v54  ;;  %v7396_v22 = vld [vmem:[#allocation19_spill] sm:$0xff] }
 0x1ea   : > { %v5709_v17 = vpop.f32.mrf.mxu1 }
 0x1eb   : > { %v5102_v27 = vpack.c.bf16 %v3527_v45, %v3526_v28  ;;  %v3265_v30 = vadd.f32 %v2970_v41, %v1775_v53  ;;  %v1786_v33 = vadd.f32 %v5709_v17, %v7389_v21  ;;  %v2973_v5 = vpop.f32.mrf.mxu0  ;;  %v3525_v43 = vmax.f32 %v3397_v10, 0.0  ;;  %v7397_v17 = vld [vmem:[#allocation20_spill] sm:$0xff] }
 0x1ec   : > { %v1777_v1 = vpop.f32.mrf.mxu1  ;;  %v3402_v50 = vadd.f32 %v7111_v34, %v3267_v18 }
 0x1ed   : > { %5278 = vst [vmem:[%s6902_s6 + $0x118] sm:$0xff] %v5102_v27   ;;  %v3268_v7 = vadd.f32 %v5839_v25, %v1786_v33  ;;  %v1778_v39 = vadd.f32 %v1777_v1, %v7390_v9  ;;  %v5842_v47 = vpop.f32.mrf.mxu0  ;;  %v5097_v60 = vpack.c.bf16 %v3525_v43, %v3524_v62  ;;  %v3400_v35 = vadd.f32 %v7111_v34, %v3265_v30 }
 0x1ee   : > { %v5712_v29 = vpop.f32.mrf.mxu1  ;;  %v3530_v46 = vmax.f32 %v3402_v50, 0.0 }
 0x1ef   : > { %v3403_v20 = vadd.f32 %v7111_v34, %v3268_v7  ;;  %v3266_v24 = vadd.f32 %v2973_v5, %v1778_v39  ;;  %v1799_v48 = vadd.f32 %v5712_v29, %v7391_v63  ;;  %v2986_v32 = vpop.f32.mrf.mxu0  ;;  %5277 = vst [vmem:[%s6902_s6 + $0x110] sm:$0xff] %v5097_v60   ;;  %v3528_v6 = vmax.f32 %v3400_v35, 0.0  ;;  %v7398_v7 = vld [vmem:[#allocation21_spill] sm:$0xff]  ;;  %v7399_v60 = vld [vmem:[#allocation22_spill] sm:$0xff] }
 0x1f0   : > { %v1790_v49 = vpop.f32.mrf.mxu1 }
 0x1f1   : > { %v3531_v38 = vmax.f32 %v3403_v20, 0.0  ;;  %v3401_v23 = vadd.f32 %v7111_v34, %v3266_v24  ;;  %v1791_v52 = vadd.f32 %v1790_v49, %v7392_v44  ;;  %v5843_v42 = vpop.f32.mrf.mxu0  ;;  %v3271_v36 = vadd.f32 %v5842_v47, %v1799_v48 }
 0x1f2   : > { %v5713_v40 = vpop.f32.mrf.mxu1 }
 0x1f3   : > { %v5112_v58 = vpack.c.bf16 %v3531_v38, %v3530_v46  ;;  %v3529_v55 = vmax.f32 %v3401_v23, 0.0  ;;  %v3269_v13 = vadd.f32 %v2986_v32, %v1791_v52  ;;  %v2989_v12 = vpop.f32.mrf.mxu0  ;;  %v1802_v31 = vadd.f32 %v5713_v40, %v7393_v2  ;;  %v7400_v46 = vld [vmem:[#allocation23_spill] sm:$0xff]  ;;  %v7401_v40 = vld [vmem:[#allocation24_spill] sm:$0xff] }
 0x1f4   : > { %v1793_v57 = vpop.f32.mrf.mxu1  ;;  %v3406_v59 = vadd.f32 %v7111_v34, %v3271_v36 }
 0x1f5   : > { %5280 = vst [vmem:[%s6902_s6 + $0x128] sm:$0xff] %v5112_v58   ;;  %v5107_v16 = vpack.c.bf16 %v3529_v55, %v3528_v6  ;;  %v1794_v11 = vadd.f32 %v1793_v57, %v7394_v56  ;;  %v5846_v0 = vpop.f32.mrf.mxu0  ;;  %v3272_v61 = vadd.f32 %v5843_v42, %v1802_v31  ;;  %v3404_v3 = vadd.f32 %v7111_v34, %v3269_v13  ;;  %v7402_v57 = vld [vmem:[#allocation25_spill] sm:$0xff] }
 0x1f6   : > { %v5716_v51 = vpop.f32.mrf.mxu1  ;;  %v3534_v18 = vmax.f32 %v3406_v59, 0.0 }
 0x1f7   : > { %5279 = vst [vmem:[%s6902_s6 + $0x120] sm:$0xff] %v5107_v16   ;;  %v3270_v26 = vadd.f32 %v2989_v12, %v1794_v11  ;;  %v1815_v19 = vadd.f32 %v5716_v51, %v7395_v15  ;;  %v3002_v4 = vpop.f32.mrf.mxu0  ;;  %v3407_v8 = vadd.f32 %v7111_v34, %v3272_v61  ;;  %v3532_v25 = vmax.f32 %v3404_v3, 0.0  ;;  %v7403_v3 = vld [vmem:[#allocation26_spill] sm:$0xff] }
 0x1f8   : > { %v1806_v41 = vpop.f32.mrf.mxu1 }
 0x1f9   : > { %v3405_v37 = vadd.f32 %v7111_v34, %v3270_v26  ;;  %v3275_v54 = vadd.f32 %v5846_v0, %v1815_v19  ;;  %v1807_v28 = vadd.f32 %v1806_v41, %v7396_v22  ;;  %v5847_v45 = vpop.f32.mrf.mxu0  ;;  %v3535_v14 = vmax.f32 %v3407_v8, 0.0 }
 0x1fa   : > { %v5717_v53 = vpop.f32.mrf.mxu1 }
 0x1fb   : > { %v3533_v10 = vmax.f32 %v3405_v37, 0.0  ;;  %v1818_v27 = vadd.f32 %v5717_v53, %v7397_v17  ;;  %v3005_v30 = vpop.f32.mrf.mxu0  ;;  %v5122_v21 = vpack.c.bf16 %v3535_v14, %v3534_v18  ;;  %v3273_v33 = vadd.f32 %v3002_v4, %v1807_v28  ;;  %v7404_v37 = vld [vmem:[#allocation27_spill] sm:$0xff]  ;;  %v7405_v17 = vld [vmem:[#allocation28_spill] sm:$0xff] }
 0x1fc   : > { %v1809_v5 = vpop.f32.mrf.mxu1  ;;  %v3410_v43 = vadd.f32 %v7111_v34, %v3275_v54 }
 0x1fd   : > { %v5117_v62 = vpack.c.bf16 %v3533_v10, %v3532_v25  ;;  %v3276_v1 = vadd.f32 %v5847_v45, %v1818_v27  ;;  %v5850_v50 = vpop.f32.mrf.mxu0  ;;  %5282 = vst [vmem:[%s6902_s6 + $0x138] sm:$0xff] %v5122_v21   ;;  %v1810_v9 = vadd.f32 %v1809_v5, %v7398_v7  ;;  %v3408_v20 = vadd.f32 %v7111_v34, %v3273_v33  ;;  %v7406_v33 = vld [vmem:[#allocation29_spill] sm:$0xff] }
 0x1fe   : > { %v5720_v39 = vpop.f32.mrf.mxu1  ;;  %v3538_v48 = vmax.f32 %v3410_v43, 0.0 }
 0x1ff   : > { %5281 = vst [vmem:[%s6902_s6 + $0x130] sm:$0xff] %v5117_v62   ;;  %v3411_v47 = vadd.f32 %v7111_v34, %v3276_v1  ;;  %v1831_v29 = vadd.f32 %v5720_v39, %v7399_v60  ;;  %v3018_v35 = vpop.f32.mrf.mxu0  ;;  %v3274_v24 = vadd.f32 %v3005_v30, %v1810_v9  ;;  %v3536_v55 = vmax.f32 %v3408_v20, 0.0  ;;  %v7407_v39 = vld [vmem:[#allocation30_spill] sm:$0xff] }
 0x200   : > { %v1822_v63 = vpop.f32.mrf.mxu1 }
 0x201   : > { %v3539_v32 = vmax.f32 %v3411_v47, 0.0  ;;  %v3279_v49 = vadd.f32 %v5850_v50, %v1831_v29  ;;  %v1823_v38 = vadd.f32 %v1822_v63, %v7400_v46  ;;  %v5851_v23 = vpop.f32.mrf.mxu0  ;;  %v3409_v44 = vadd.f32 %v7111_v34, %v3274_v24  ;;  %v7408_v63 = vld [vmem:[#allocation31_spill] sm:$0xff] }
 0x202   : > { %v5721_v52 = vpop.f32.mrf.mxu1 }
 0x203   : > { %v5132_v42 = vpack.c.bf16 %v3539_v32, %v3538_v48  ;;  %v3277_v36 = vadd.f32 %v3018_v35, %v1823_v38  ;;  %v1834_v6 = vadd.f32 %v5721_v52, %v7401_v40  ;;  %v3021_v58 = vpop.f32.mrf.mxu0  ;;  %v3537_v13 = vmax.f32 %v3409_v44, 0.0  ;;  %v7409_v52 = vld [vmem:[#allocation32_spill] sm:$0xff] }
 0x204   : > { %v1825_v12 = vpop.f32.mrf.mxu1  ;;  %v3414_v2 = vadd.f32 %v7111_v34, %v3279_v49 }
 0x205   : > { %5284 = vst [vmem:[%s6902_s6 + $0x148] sm:$0xff] %v5132_v42   ;;  %v3280_v31 = vadd.f32 %v5851_v23, %v1834_v6  ;;  %v1826_v16 = vadd.f32 %v1825_v12, %v7402_v57  ;;  %v5854_v56 = vpop.f32.mrf.mxu0  ;;  %v5127_v11 = vpack.c.bf16 %v3537_v13, %v3536_v55  ;;  %v3412_v59 = vadd.f32 %v7111_v34, %v3277_v36 }
 0x206   : > { %v5724_v0 = vpop.f32.mrf.mxu1  ;;  %v3542_v4 = vmax.f32 %v3414_v2, 0.0 }
 0x207   : > { %v3415_v61 = vadd.f32 %v7111_v34, %v3280_v31  ;;  %v3278_v51 = vadd.f32 %v3021_v58, %v1826_v16  ;;  %v1847_v26 = vadd.f32 %v5724_v0, %v7403_v3  ;;  %v3034_v15 = vpop.f32.mrf.mxu0  ;;  %5283 = vst [vmem:[%s6902_s6 + $0x140] sm:$0xff] %v5127_v11   ;;  %v3540_v18 = vmax.f32 %v3412_v59, 0.0  ;;  %v7410_v31 = vld [vmem:[#allocation33_spill] sm:$0xff]  ;;  %v7411_v11 = vld [vmem:[#allocation34_spill] sm:$0xff] }
 0x208   : > { %v1838_v19 = vpop.f32.mrf.mxu1 }
 0x209   : > { %v3543_v8 = vmax.f32 %v3415_v61, 0.0  ;;  %v3413_v41 = vadd.f32 %v7111_v34, %v3278_v51  ;;  %v1839_v54 = vadd.f32 %v1838_v19, %v7404_v37  ;;  %v5855_v22 = vpop.f32.mrf.mxu0  ;;  %v3283_v28 = vadd.f32 %v5854_v56, %v1847_v26 }
 0x20a   : > { %v5725_v45 = vpop.f32.mrf.mxu1 }
 0x20b   : > { %v5142_v14 = vpack.c.bf16 %v3543_v8, %v3542_v4  ;;  %v3541_v53 = vmax.f32 %v3413_v41, 0.0  ;;  %v3281_v25 = vadd.f32 %v3034_v15, %v1839_v54  ;;  %v3037_v10 = vpop.f32.mrf.mxu0  ;;  %v1850_v27 = vadd.f32 %v5725_v45, %v7405_v17  ;;  %v7412_v4 = vld [vmem:[#allocation35_spill] sm:$0xff]  ;;  %v7413_v45 = vld [vmem:[#allocation36_spill] sm:$0xff] }
 0x20c   : > { %v1841_v30 = vpop.f32.mrf.mxu1  ;;  %v3418_v43 = vadd.f32 %v7111_v34, %v3283_v28 }
 0x20d   : > { %5286 = vst [vmem:[%s6902_s6 + $0x158] sm:$0xff] %v5142_v14   ;;  %v5137_v21 = vpack.c.bf16 %v3541_v53, %v3540_v18  ;;  %v1842_v5 = vadd.f32 %v1841_v30, %v7406_v33  ;;  %v5858_v62 = vpop.f32.mrf.mxu0  ;;  %v3284_v1 = vadd.f32 %v5855_v22, %v1850_v27  ;;  %v3416_v7 = vadd.f32 %v7111_v34, %v3281_v25  ;;  %v7414_v30 = vld [vmem:[#allocation37_spill] sm:$0xff] }
 0x20e   : > { %v5728_v50 = vpop.f32.mrf.mxu1  ;;  %v3546_v49 = vmax.f32 %v3418_v43, 0.0 }
 0x20f   : > { %5285 = vst [vmem:[%s6902_s6 + $0x150] sm:$0xff] %v5137_v21   ;;  %v3282_v9 = vadd.f32 %v3037_v10, %v1842_v5  ;;  %v1863_v47 = vadd.f32 %v5728_v50, %v7407_v39  ;;  %v3050_v60 = vpop.f32.mrf.mxu0  ;;  %v3419_v29 = vadd.f32 %v7111_v34, %v3284_v1  ;;  %v3544_v23 = vmax.f32 %v3416_v7, 0.0  ;;  %v7415_v7 = vld [vmem:[#allocation38_spill] sm:$0xff] }
 0x210   : > { %v1854_v35 = vpop.f32.mrf.mxu1 }
 0x211   : > { %v3417_v20 = vadd.f32 %v7111_v34, %v3282_v9  ;;  %v3287_v24 = vadd.f32 %v5858_v62, %v1863_v47  ;;  %v1855_v48 = vadd.f32 %v1854_v35, %v7408_v63  ;;  %v5859_v32 = vpop.f32.mrf.mxu0  ;;  %v3547_v46 = vmax.f32 %v3419_v29, 0.0 }
 0x212   : > { %v5729_v38 = vpop.f32.mrf.mxu1 }
 0x213   : > { %v3545_v44 = vmax.f32 %v3417_v20, 0.0  ;;  %v1866_v42 = vadd.f32 %v5729_v38, %v7409_v52  ;;  %v3053_v36 = vpop.f32.mrf.mxu0  ;;  %v5152_v40 = vpack.c.bf16 %v3547_v46, %v3546_v49  ;;  %v3285_v6 = vadd.f32 %v3050_v60, %v1855_v48  ;;  %v7416_v20 = vld [vmem:[#allocation39_spill] sm:$0xff]  ;;  %v7417_v52 = vld [vmem:[#allocation40_spill] sm:$0xff] }
 0x214   : > { %v1857_v58 = vpop.f32.mrf.mxu1  ;;  %v3422_v13 = vadd.f32 %v7111_v34, %v3287_v24 }
 0x215   : > { %v5147_v55 = vpack.c.bf16 %v3545_v44, %v3544_v23  ;;  %v3288_v12 = vadd.f32 %v5859_v32, %v1866_v42  ;;  %v5862_v2 = vpop.f32.mrf.mxu0  ;;  %5288 = vst [vmem:[%s6902_s6 + $0x168] sm:$0xff] %v5152_v40   ;;  %v1858_v57 = vadd.f32 %v1857_v58, %v7410_v31  ;;  %v3420_v61 = vadd.f32 %v7111_v34, %v3285_v6  ;;  %v7418_v6 = vld [vmem:[#allocation41_spill] sm:$0xff] }
 0x216   : > { %v5732_v16 = vpop.f32.mrf.mxu1  ;;  %v3550_v26 = vmax.f32 %v3422_v13, 0.0 }
 0x217   : > { %5287 = vst [vmem:[%s6902_s6 + $0x160] sm:$0xff] %v5147_v55   ;;  %v3423_v56 = vadd.f32 %v7111_v34, %v3288_v12  ;;  %v1879_v0 = vadd.f32 %v5732_v16, %v7411_v11  ;;  %v3066_v59 = vpop.f32.mrf.mxu0  ;;  %v3286_v51 = vadd.f32 %v3053_v36, %v1858_v57  ;;  %v3548_v53 = vmax.f32 %v3420_v61, 0.0  ;;  %v7419_v16 = vld [vmem:[#allocation42_spill] sm:$0xff] }
 0x218   : > { %v1870_v3 = vpop.f32.mrf.mxu1 }
 0x219   : > { %v3551_v15 = vmax.f32 %v3423_v56, 0.0  ;;  %v3291_v19 = vadd.f32 %v5862_v2, %v1879_v0  ;;  %v1871_v8 = vadd.f32 %v1870_v3, %v7412_v4  ;;  %v5863_v41 = vpop.f32.mrf.mxu0  ;;  %v3421_v37 = vadd.f32 %v7111_v34, %v3286_v51  ;;  %v7420_v3 = vld [vmem:[#allocation43_spill] sm:$0xff] }
 0x21a   : > { %v5733_v54 = vpop.f32.mrf.mxu1 }
 0x21b   : > { %v5162_v22 = vpack.c.bf16 %v3551_v15, %v3550_v26  ;;  %v3289_v28 = vadd.f32 %v3066_v59, %v1871_v8  ;;  %v1882_v18 = vadd.f32 %v5733_v54, %v7413_v45  ;;  %v3069_v14 = vpop.f32.mrf.mxu0  ;;  %v3549_v25 = vmax.f32 %v3421_v37, 0.0  ;;  %v7421_v54 = vld [vmem:[#allocation44_spill] sm:$0xff] }
 0x21c   : > { %v1873_v10 = vpop.f32.mrf.mxu1  ;;  %v3426_v17 = vadd.f32 %v7111_v34, %v3291_v19 }
 0x21d   : > { %5290 = vst [vmem:[%s6902_s6 + $0x178] sm:$0xff] %v5162_v22   ;;  %v3292_v27 = vadd.f32 %v5863_v41, %v1882_v18  ;;  %v1874_v21 = vadd.f32 %v1873_v10, %v7414_v30  ;;  %v5866_v33 = vpop.f32.mrf.mxu0  ;;  %v5157_v5 = vpack.c.bf16 %v3549_v25, %v3548_v53  ;;  %v3424_v43 = vadd.f32 %v7111_v34, %v3289_v28 }
 0x21e   : > { %v5736_v62 = vpop.f32.mrf.mxu1  ;;  %v3554_v60 = vmax.f32 %v3426_v17, 0.0 }
 0x21f   : > { %v3427_v1 = vadd.f32 %v7111_v34, %v3292_v27  ;;  %v3290_v50 = vadd.f32 %v3069_v14, %v1874_v21  ;;  %v1895_v9 = vadd.f32 %v5736_v62, %v7415_v7  ;;  %v3082_v39 = vpop.f32.mrf.mxu0  ;;  %5289 = vst [vmem:[%s6902_s6 + $0x170] sm:$0xff] %v5157_v5   ;;  %v3552_v49 = vmax.f32 %v3424_v43, 0.0  ;;  %v7422_v27 = vld [vmem:[#allocation45_spill] sm:$0xff]  ;;  %v7423_v5 = vld [vmem:[#allocation47_spill] sm:$0xff] }
 0x220   : > { %v1886_v47 = vpop.f32.mrf.mxu1 }
 0x221   : > { %v3555_v29 = vmax.f32 %v3427_v1, 0.0  ;;  %v3425_v35 = vadd.f32 %v7111_v34, %v3290_v50  ;;  %v1887_v24 = vadd.f32 %v1886_v47, %v7416_v20  ;;  %v5867_v63 = vpop.f32.mrf.mxu0  ;;  %v3295_v48 = vadd.f32 %v5866_v33, %v1895_v9 }
 0x222   : > { %v5737_v32 = vpop.f32.mrf.mxu1 }
 0x223   : > { %v5172_v46 = vpack.c.bf16 %v3555_v29, %v3554_v60  ;;  %v3553_v38 = vmax.f32 %v3425_v35, 0.0  ;;  %v3293_v23 = vadd.f32 %v3082_v39, %v1887_v24  ;;  %v3085_v44 = vpop.f32.mrf.mxu0  ;;  %v1898_v42 = vadd.f32 %v5737_v32, %v7417_v52  ;;  %v7424_v60 = vld [vmem:[#allocation49_spill] sm:$0xff]  ;;  %v7425_v32 = vld [vmem:[#allocation51_spill] sm:$0xff] }
 0x224   : > { %v1889_v36 = vpop.f32.mrf.mxu1  ;;  %v3430_v13 = vadd.f32 %v7111_v34, %v3295_v48 }
 0x225   : > { %5292 = vst [vmem:[%s6902_s6 + $0x188] sm:$0xff] %v5172_v46   ;;  %v5167_v40 = vpack.c.bf16 %v3553_v38, %v3552_v49  ;;  %v1890_v58 = vadd.f32 %v1889_v36, %v7418_v6  ;;  %v5870_v55 = vpop.f32.mrf.mxu0  ;;  %v3296_v12 = vadd.f32 %v5867_v63, %v1898_v42  ;;  %v3428_v31 = vadd.f32 %v7111_v34, %v3293_v23  ;;  %v7426_v36 = vld [vmem:[#allocation53_spill] sm:$0xff] }
 0x226   : > { %v5740_v2 = vpop.f32.mrf.mxu1  ;;  %v3558_v19 = vmax.f32 %v3430_v13, 0.0 }
 0x227   : > { %5291 = vst [vmem:[%s6902_s6 + $0x180] sm:$0xff] %v5167_v40   ;;  %v3294_v57 = vadd.f32 %v3085_v44, %v1890_v58  ;;  %v1911_v56 = vadd.f32 %v5740_v2, %v7419_v16  ;;  %v3098_v11 = vpop.f32.mrf.mxu0  ;;  %v3431_v0 = vadd.f32 %v7111_v34, %v3296_v12  ;;  %v3556_v41 = vmax.f32 %v3428_v31, 0.0  ;;  %v7427_v31 = vld [vmem:[#allocation55_spill] sm:$0xff] }
 0x228   : > { %v1902_v59 = vpop.f32.mrf.mxu1 }
 0x229   : > { %v3429_v61 = vadd.f32 %v7111_v34, %v3294_v57  ;;  %v3299_v51 = vadd.f32 %v5870_v55, %v1911_v56  ;;  %v1903_v26 = vadd.f32 %v1902_v59, %v7420_v3  ;;  %v5871_v15 = vpop.f32.mrf.mxu0  ;;  %v3559_v4 = vmax.f32 %v3431_v0, 0.0 }
 0x22a   : > { %v5741_v8 = vpop.f32.mrf.mxu1 }
 0x22b   : > { %v3557_v37 = vmax.f32 %v3429_v61, 0.0  ;;  %v1914_v22 = vadd.f32 %v5741_v8, %v7421_v54  ;;  %v3101_v28 = vpop.f32.mrf.mxu0  ;;  %v5182_v45 = vpack.c.bf16 %v3559_v4, %v3558_v19  ;;  %v3297_v18 = vadd.f32 %v3098_v11, %v1903_v26  ;;  %v7428_v61 = vld [vmem:[#allocation57_spill] sm:$0xff]  ;;  %v7429_v54 = vld [vmem:[#allocation59_spill] sm:$0xff] }
 0x22c   : > { %v1905_v14 = vpop.f32.mrf.mxu1  ;;  %v3434_v25 = vadd.f32 %v7111_v34, %v3299_v51 }
 0x22d   : > { %v5177_v53 = vpack.c.bf16 %v3557_v37, %v3556_v41  ;;  %v3300_v10 = vadd.f32 %v5871_v15, %v1914_v22  ;;  %v5874_v17 = vpop.f32.mrf.mxu0  ;;  %5294 = vst [vmem:[%s6902_s6 + $0x198] sm:$0xff] %v5182_v45   ;;  %v1906_v30 = vadd.f32 %v1905_v14, %v7422_v27  ;;  %v3432_v1 = vadd.f32 %v7111_v34, %v3297_v18  ;;  %v7430_v18 = vld [vmem:[#allocation61_spill] sm:$0xff] }
 0x22e   : > { %v5744_v21 = vpop.f32.mrf.mxu1  ;;  %v3562_v9 = vmax.f32 %v3434_v25, 0.0 }
 0x22f   : > { %5293 = vst [vmem:[%s6902_s6 + $0x190] sm:$0xff] %v5177_v53   ;;  %v3435_v33 = vadd.f32 %v7111_v34, %v3300_v10  ;;  %v1927_v62 = vadd.f32 %v5744_v21, %v7423_v5  ;;  %v3114_v43 = vpop.f32.mrf.mxu0  ;;  %v3298_v50 = vadd.f32 %v3101_v28, %v1906_v30  ;;  %v3560_v38 = vmax.f32 %v3432_v1, 0.0  ;;  %v7431_v21 = vld [vmem:[#allocation63_spill] sm:$0xff] }
 0x230   : > { %v1918_v7 = vpop.f32.mrf.mxu1 }
 0x231   : > { %v3563_v39 = vmax.f32 %v3435_v33, 0.0  ;;  %v3303_v47 = vadd.f32 %v5874_v17, %v1927_v62  ;;  %v1919_v29 = vadd.f32 %v1918_v7, %v7424_v60  ;;  %v5875_v35 = vpop.f32.mrf.mxu0  ;;  %v3433_v20 = vadd.f32 %v7111_v34, %v3298_v50  ;;  %v7432_v7 = vld [vmem:[#allocation65_spill] sm:$0xff] }
 0x232   : > { %v5745_v24 = vpop.f32.mrf.mxu1 }
 0x233   : > { %v5192_v63 = vpack.c.bf16 %v3563_v39, %v3562_v9  ;;  %v3301_v48 = vadd.f32 %v3114_v43, %v1919_v29  ;;  %v1930_v49 = vadd.f32 %v5745_v24, %v7425_v32  ;;  %v3117_v46 = vpop.f32.mrf.mxu0  ;;  %v3561_v23 = vmax.f32 %v3433_v20, 0.0  ;;  %v7433_v24 = vld [vmem:[#allocation67_spill] sm:$0xff] }
 0x234   : > { %v1921_v44 = vpop.f32.mrf.mxu1  ;;  %v3438_v52 = vadd.f32 %v7111_v34, %v3303_v47 }
 0x235   : > { %5296 = vst [vmem:[%s6902_s6 + $0x1a8] sm:$0xff] %v5192_v63   ;;  %v3304_v42 = vadd.f32 %v5875_v35, %v1930_v49  ;;  %v1922_v40 = vadd.f32 %v1921_v44, %v7426_v36  ;;  %v5878_v6 = vpop.f32.mrf.mxu0  ;;  %v5187_v58 = vpack.c.bf16 %v3561_v23, %v3560_v38  ;;  %v3436_v13 = vadd.f32 %v7111_v34, %v3301_v48 }
 0x236   : > { %v5748_v55 = vpop.f32.mrf.mxu1  ;;  %v3566_v11 = vmax.f32 %v3438_v52, 0.0 }
 0x237   : > { %v3439_v12 = vadd.f32 %v7111_v34, %v3304_v42  ;;  %v3302_v2 = vadd.f32 %v3117_v46, %v1922_v40  ;;  %v1943_v57 = vadd.f32 %v5748_v55, %v7427_v31  ;;  %v3130_v16 = vpop.f32.mrf.mxu0  ;;  %5295 = vst [vmem:[%s6902_s6 + $0x1a0] sm:$0xff] %v5187_v58   ;;  %v3564_v19 = vmax.f32 %v3436_v13, 0.0  ;;  %v7434_v42 = vld [vmem:[#allocation69_spill] sm:$0xff]  ;;  %v7435_v58 = vld [vmem:[#allocation71_spill] sm:$0xff] }
 0x238   : > { %v1934_v56 = vpop.f32.mrf.mxu1 }
 0x239   : > { %v3567_v0 = vmax.f32 %v3439_v12, 0.0  ;;  %v3437_v59 = vadd.f32 %v7111_v34, %v3302_v2  ;;  %v1935_v51 = vadd.f32 %v1934_v56, %v7428_v61  ;;  %v5879_v3 = vpop.f32.mrf.mxu0  ;;  %v3307_v26 = vadd.f32 %v5878_v6, %v1943_v57 }
 0x23a   : > { %v5749_v15 = vpop.f32.mrf.mxu1 }
 0x23b   : > { %v5202_v4 = vpack.c.bf16 %v3567_v0, %v3566_v11  ;;  %v3565_v8 = vmax.f32 %v3437_v59, 0.0  ;;  %v3305_v41 = vadd.f32 %v3130_v16, %v1935_v51  ;;  %v3133_v37 = vpop.f32.mrf.mxu0  ;;  %v1946_v22 = vadd.f32 %v5749_v15, %v7429_v54  ;;  %v7436_v11 = vld [vmem:[#allocation73_spill] sm:$0xff]  ;;  %v7437_v15 = vld [vmem:[#allocation75_spill] sm:$0xff] }
 0x23c   : > { %v1937_v28 = vpop.f32.mrf.mxu1  ;;  %v3442_v25 = vadd.f32 %v7111_v34, %v3307_v26 }
 0x23d   : > { %5298 = vst [vmem:[%s6902_s6 + $0x1b8] sm:$0xff] %v5202_v4   ;;  %v5197_v45 = vpack.c.bf16 %v3565_v8, %v3564_v19  ;;  %v1938_v14 = vadd.f32 %v1937_v28, %v7430_v18  ;;  %v5882_v53 = vpop.f32.mrf.mxu0  ;;  %v3308_v10 = vadd.f32 %v5879_v3, %v1946_v22  ;;  %v3440_v27 = vadd.f32 %v7111_v34, %v3305_v41  ;;  %v7438_v28 = vld [vmem:[#allocation77_spill] sm:$0xff] }
 0x23e   : > { %v5752_v17 = vpop.f32.mrf.mxu1  ;;  %v3570_v47 = vmax.f32 %v3442_v25, 0.0 }
 0x23f   : > { %5297 = vst [vmem:[%s6902_s6 + $0x1b0] sm:$0xff] %v5197_v45   ;;  %v3306_v30 = vadd.f32 %v3133_v37, %v1938_v14  ;;  %v1959_v33 = vadd.f32 %v5752_v17, %v7431_v21  ;;  %v3146_v5 = vpop.f32.mrf.mxu0  ;;  %v3443_v62 = vadd.f32 %v7111_v34, %v3308_v10  ;;  %v3568_v35 = vmax.f32 %v3440_v27, 0.0  ;;  %v7439_v27 = vld [vmem:[#allocation79_spill] sm:$0xff] }
 0x240   : > { %v1950_v43 = vpop.f32.mrf.mxu1 }
 0x241   : > { %v3441_v1 = vadd.f32 %v7111_v34, %v3306_v30  ;;  %v3311_v50 = vadd.f32 %v5882_v53, %v1959_v33  ;;  %v1951_v9 = vadd.f32 %v1950_v43, %v7432_v7  ;;  %v5883_v39 = vpop.f32.mrf.mxu0  ;;  %v3571_v60 = vmax.f32 %v3443_v62, 0.0 }
 0x242   : > { %v5753_v29 = vpop.f32.mrf.mxu1 }
 0x243   : > { %v3569_v20 = vmax.f32 %v3441_v1, 0.0  ;;  %v1962_v63 = vadd.f32 %v5753_v29, %v7433_v24  ;;  %v3149_v48 = vpop.f32.mrf.mxu0  ;;  %v5212_v32 = vpack.c.bf16 %v3571_v60, %v3570_v47  ;;  %v3309_v49 = vadd.f32 %v3146_v5, %v1951_v9  ;;  %v7440_v1 = vld [vmem:[#allocation81_spill] sm:$0xff] }
 0x244   : > { %v1953_v46 = vpop.f32.mrf.mxu1  ;;  %v3446_v23 = vadd.f32 %v7111_v34, %v3311_v50 }
 0x245   : > { %v5207_v38 = vpack.c.bf16 %v3569_v20, %v3568_v35  ;;  %v3312_v44 = vadd.f32 %v5883_v39, %v1962_v63  ;;  %v5886_v52 = vpop.f32.mrf.mxu0  ;;  %5300 = vst [vmem:[%s6902_s6 + $0x1c8] sm:$0xff] %v5212_v32   ;;  %v1954_v36 = vadd.f32 %v1953_v46, %v7434_v42  ;;  %v3444_v12 = vadd.f32 %v7111_v34, %v3309_v49  ;;  %v7441_v20 = vld [vmem:[#allocation83_spill] sm:$0xff]  ;;  %v7442_v32 = vld [vmem:[#allocation85_spill] sm:$0xff] }
 0x246   : > { %v5756_v40 = vpop.f32.mrf.mxu1  ;;  %v3574_v57 = vmax.f32 %v3446_v23, 0.0 }
 0x247   : > { %5299 = vst [vmem:[%s6902_s6 + $0x1c0] sm:$0xff] %v5207_v38   ;;  %v3447_v6 = vadd.f32 %v7111_v34, %v3312_v44  ;;  %v1975_v55 = vadd.f32 %v5756_v40, %v7435_v58  ;;  %v3162_v13 = vpop.f32.mrf.mxu0  ;;  %v3310_v2 = vadd.f32 %v3149_v48, %v1954_v36  ;;  %v3572_v8 = vmax.f32 %v3444_v12, 0.0 }
 0x248   : > { %v1966_v31 = vpop.f32.mrf.mxu1 }
 0x249   : > { %v3575_v16 = vmax.f32 %v3447_v6, 0.0  ;;  %v3315_v56 = vadd.f32 %v5886_v52, %v1975_v55  ;;  %v1967_v0 = vadd.f32 %v1966_v31, %v7436_v11  ;;  %v5887_v59 = vpop.f32.mrf.mxu0  ;;  %v3445_v61 = vadd.f32 %v7111_v34, %v3310_v2 }
 0x24a   : > { %v5757_v51 = vpop.f32.mrf.mxu1 }
 0x24b   : > { %v5222_v3 = vpack.c.bf16 %v3575_v16, %v3574_v57  ;;  %v3313_v26 = vadd.f32 %v3162_v13, %v1967_v0  ;;  %v1978_v19 = vadd.f32 %v5757_v51, %v7437_v15  ;;  %v3165_v4 = vpop.f32.mrf.mxu0  ;;  %v3573_v41 = vmax.f32 %v3445_v61, 0.0 }
 0x24c   : > { %v1969_v37 = vpop.f32.mrf.mxu1  ;;  %v3450_v54 = vadd.f32 %v7111_v34, %v3315_v56 }
 0x24d   : > { %5302 = vst [vmem:[%s6902_s6 + $0x1d8] sm:$0xff] %v5222_v3   ;;  %v3316_v22 = vadd.f32 %v5887_v59, %v1978_v19  ;;  %v1970_v45 = vadd.f32 %v1969_v37, %v7438_v28  ;;  %v5890_v18 = vpop.f32.mrf.mxu0  ;;  %v5217_v14 = vpack.c.bf16 %v3573_v41, %v3572_v8  ;;  %v3448_v25 = vadd.f32 %v7111_v34, %v3313_v26 }
 0x24e   : > { %v5760_v53 = vpop.f32.mrf.mxu1  ;;  %v3578_v5 = vmax.f32 %v3450_v54, 0.0 }
 0x24f   : > { %v3451_v10 = vadd.f32 %v7111_v34, %v3316_v22  ;;  %v3314_v17 = vadd.f32 %v3165_v4, %v1970_v45  ;;  %v1991_v30 = vadd.f32 %v5760_v53, %v7439_v27  ;;  %v3178_v21 = vpop.f32.mrf.mxu0  ;;  %5301 = vst [vmem:[%s6902_s6 + $0x1d0] sm:$0xff] %v5217_v14   ;;  %v3576_v47 = vmax.f32 %v3448_v25, 0.0 }
 0x250   : > { %v1982_v33 = vpop.f32.mrf.mxu1 }
 0x251   : > { %v3579_v62 = vmax.f32 %v3451_v10, 0.0  ;;  %v3449_v43 = vadd.f32 %v7111_v34, %v3314_v17  ;;  %v1983_v50 = vadd.f32 %v1982_v33, %v7440_v1  ;;  %v3319_v7 = vadd.f32 %v5890_v18, %v1991_v30  ;;  %v5891_v39 = vpop.f32.mrf.mxu0 }
 0x252   : > { %v5761_v9 = vpop.f32.mrf.mxu1 }
 0x253   : > { %v5232_v60 = vpack.c.bf16 %v3579_v62, %v3578_v5  ;;  %v3577_v29 = vmax.f32 %v3449_v43, 0.0  ;;  %v3317_v35 = vadd.f32 %v3178_v21, %v1983_v50  ;;  %v1994_v24 = vadd.f32 %v5761_v9, %v7441_v20  ;;  %v3181_v23 = vpop.f32.mrf.mxu0 }
 0x254   : > { %v1985_v63 = vpop.f32.mrf.mxu1  ;;  %v3454_v46 = vadd.f32 %v7111_v34, %v3319_v7 }
 0x255   : > { %5304 = vst [vmem:[%s6902_s6 + $0x1e8] sm:$0xff] %v5232_v60   ;;  %v5227_v48 = vpack.c.bf16 %v3577_v29, %v3576_v47  ;;  %v1986_v49 = vadd.f32 %v1985_v63, %v7442_v32  ;;  %v3320_v38 = vadd.f32 %v5891_v39, %v1994_v24  ;;  %v3452_v44 = vadd.f32 %v7111_v34, %v3317_v35 }
 0x256   : > { %v3582_v40 = vmax.f32 %v3454_v46, 0.0 }
 0x257   : > { %5303 = vst [vmem:[%s6902_s6 + $0x1e0] sm:$0xff] %v5227_v48   ;;  %v3318_v52 = vadd.f32 %v3181_v23, %v1986_v49  ;;  %v3455_v42 = vadd.f32 %v7111_v34, %v3320_v38  ;;  %v3580_v58 = vmax.f32 %v3452_v44, 0.0 }
 0x259   : > { %v3453_v36 = vadd.f32 %v7111_v34, %v3318_v52  ;;  %v3583_v6 = vmax.f32 %v3455_v42, 0.0 }
 0x25b   : > { %v3581_v55 = vmax.f32 %v3453_v36, 0.0  ;;  %v5242_v13 = vpack.c.bf16 %v3583_v6, %v3582_v40 }
 0x25d   : > { %v5237_v12 = vpack.c.bf16 %v3581_v55, %v3580_v58  ;;  %5306 = vst [vmem:[%s6902_s6 + $0x1f8] sm:$0xff] %v5242_v13  }
 0x25f   : > { %5305 = vst [vmem:[%s6902_s6 + $0x1f0] sm:$0xff] %v5237_v12  }
 0x260 PF: > { %s13_s14 = sadd.s32 1, %s6101_s14   ;;  %s7443_s12 = smov %s6097_s13 }
 0x261   : > { %p10_p6 = scmp.ge.s32.totalorder %s13_s14, 4   ;;  %s7444_s13 = smov %s7446_s15 }
 0x263   :  { %12 = sbr.rel (!%p10_p6) target bundleno = 2 (0x2), region = 70 }

</bundles_post_ra>
